<compile_context>
chip_gen: v7x
topology: tpu7x:2x2x1
jax: 0.10.0
libtpu: 0.0.40
codegen_flags: <defaults>
</compile_context>

<pallas_src>
import functools
import math

import numpy as np
import jax
import jax.numpy as jnp
from jax.experimental import pallas as pl
from jax.experimental.pallas import tpu as pltpu


_SQRT_HALF = 0.7071067811865476


def _activation(x, act):
    # f32 element-wise epilogue (VPU / EUP); mirrors torch get_activation_fn.
    if act == "gelu":                     # exact erf GELU == torch.nn.GELU()
        return 0.5 * x * (1.0 + jax.lax.erf(x * _SQRT_HALF))
    if act == "relu":
        return jnp.maximum(x, 0.0)
    if act in ("swish", "silu"):
        return x * jax.nn.sigmoid(x)
    if act == "none":
        return x
    raise ValueError(f"unsupported activation: {act}")


def _mlp_fused_kernel(*refs, n_layers, act):
    """refs = (x_ref, w0, b0, w1, b1, ..., o_ref).

    Keeps one (block_rows, d) activation tile live across all layers; every
    matmul runs on the MXU with bf16 operands and f32 accumulation.
    """
    x_ref = refs[0]
    o_ref = refs[1 + 2 * n_layers]

    h = x_ref[...]                                      # (block_rows, d_in) f32
    for layer in range(n_layers):
        w_ref = refs[1 + 2 * layer]                     # (d_l, d_{l+1}) bf16
        b_ref = refs[2 + 2 * layer]                     # (1,   d_{l+1}) f32
        h = jnp.dot(h.astype(jnp.bfloat16), w_ref[...],
                    preferred_element_type=jnp.float32)
        h = _activation(h + b_ref[...], act)            # f32 epilogue
    o_ref[...] = h.astype(o_ref.dtype)


def mlp_forward(x, params, *, activation="gelu", block_rows=128):
    """Pallas MLP forward.

    x:      (..., d_in)  float32
    params: [(W_i, b_i)] with W_i: (d_i, d_{i+1}), b_i: (d_{i+1},)
    returns (..., d_out) float32
    """
    lead_shape = x.shape[:-1]
    d_in = x.shape[-1]
    m = int(np.prod(lead_shape)) if lead_shape else 1
    d_out = params[-1][0].shape[-1]
    n_layers = len(params)

    x2 = x.reshape(m, d_in).astype(jnp.float32)

    # Row tile: multiple of 8 (sublane), at most block_rows; pad M up to a
    # multiple so the (8, 128) block constraint is always satisfied.
    tm = min(block_rows, max(8, -(-m // 8) * 8))
    m_pad = pl.cdiv(m, tm) * tm
    if m_pad != m:
        x2 = jnp.pad(x2, ((0, m_pad - m), (0, 0)))

    inputs = [x2]
    in_specs = [pl.BlockSpec((tm, d_in), lambda i: (i, 0))]
    for w, b in params:
        di, do = w.shape
        inputs.append(w.astype(jnp.bfloat16))           # bf16 MXU operand in HBM
        in_specs.append(pl.BlockSpec((di, do), lambda i: (0, 0)))
        inputs.append(b.reshape(1, do).astype(jnp.float32))
        in_specs.append(pl.BlockSpec((1, do), lambda i: (0, 0)))

    out = pl.pallas_call(
        functools.partial(_mlp_fused_kernel, n_layers=n_layers, act=activation),
        out_shape=jax.ShapeDtypeStruct((m_pad, d_out), jnp.float32),
        grid_spec=pltpu.PrefetchScalarGridSpec(
            num_scalar_prefetch=0,
            grid=(m_pad // tm,),
            in_specs=in_specs,
            out_specs=pl.BlockSpec((tm, d_out), lambda i: (i, 0)),
        ),
        compiler_params=pltpu.CompilerParams(
            dimension_semantics=("parallel",),          # independent row blocks
        ),
    )(*inputs)

    return out[:m].reshape(*lead_shape, d_out)


# -----------------------------------------------------------------------------
if __name__ == "__main__":
    key = jax.random.PRNGKey(0)

    # Small but lane-dense shapes (all feature dims multiples of 128).
    batch, seq = 2, 128
    dim_list = [128, 256, 256, 128]
    activation = "gelu"

    k_x, key = jax.random.split(key)
    x = jax.random.normal(k_x, (batch, seq, dim_list[0]), jnp.float32)

    params = []
    for i in range(len(dim_list) - 1):
        key, kw, kb = jax.random.split(key, 3)
        w = (jax.random.normal(kw, (dim_list[i], dim_list[i + 1]), jnp.float32)
             / math.sqrt(dim_list[i]))
        b = 0.01 * jax.random.normal(kb, (dim_list[i + 1],), jnp.float32)
        params.append((w, b))

    fwd = jax.jit(functools.partial(mlp_forward, activation=activation))
    out = jax.block_until_ready(fwd(x, params))

    # Pure-JAX reference with the same bf16-matmul / f32-accumulate numerics.
    ref = x.reshape(-1, dim_list[0])
    for w, b in params:
        ref = jnp.dot(ref.astype(jnp.bfloat16), w.astype(jnp.bfloat16),
                      preferred_element_type=jnp.float32) + b
        ref = 0.5 * ref * (1.0 + jax.lax.erf(ref * _SQRT_HALF))
    ref = ref.reshape(batch, seq, dim_list[-1])

    assert out.shape == (batch, seq, dim_list[-1]), out.shape
    assert bool(jnp.all(jnp.isfinite(out)))
    np.testing.assert_allclose(np.asarray(out), np.asarray(ref),
                               atol=2e-2, rtol=2e-2)
    print("KERNEL_OK")
</pallas_src>

<mosaic_0001>
module attributes {stable_mosaic.version = 11 : i64} {
  func.func @_mlp_fused_kernel(%arg0: i32, %arg1: memref<128x128xf32, #tpu.memory_space<vmem>>, %arg2: memref<128x256xbf16, #tpu.memory_space<vmem>>, %arg3: memref<1x256xf32, #tpu.memory_space<vmem>>, %arg4: memref<256x256xbf16, #tpu.memory_space<vmem>>, %arg5: memref<1x256xf32, #tpu.memory_space<vmem>>, %arg6: memref<256x128xbf16, #tpu.memory_space<vmem>>, %arg7: memref<1x128xf32, #tpu.memory_space<vmem>>, %arg8: memref<128x128xf32, #tpu.memory_space<vmem>>) attributes {dimension_semantics = [#tpu.dimension_semantics<parallel>], iteration_bounds = array<i64: 2>, scalar_prefetch = 0 : i64, scratch_operands = 0 : i64, tpu.core_type = #tpu.core_type<tc>, window_params = [{transform_indices = @transform_0, window_bounds = array<i64: 128, 128>}, {pipeline_mode = #tpu.pipeline_mode<synchronous>, transform_indices = @transform_1, window_bounds = array<i64: 128, 256>}, {pipeline_mode = #tpu.pipeline_mode<synchronous>, transform_indices = @transform_2, window_bounds = array<i64: 1, 256>}, {pipeline_mode = #tpu.pipeline_mode<synchronous>, transform_indices = @transform_3, window_bounds = array<i64: 256, 256>}, {pipeline_mode = #tpu.pipeline_mode<synchronous>, transform_indices = @transform_4, window_bounds = array<i64: 1, 256>}, {pipeline_mode = #tpu.pipeline_mode<synchronous>, transform_indices = @transform_5, window_bounds = array<i64: 256, 128>}, {pipeline_mode = #tpu.pipeline_mode<synchronous>, transform_indices = @transform_6, window_bounds = array<i64: 1, 128>}, {transform_indices = @transform_7, window_bounds = array<i64: 128, 128>}]} {
    %c0 = arith.constant 0 : index
    %c0_0 = arith.constant 0 : index
    %0 = vector.load %arg1[%c0, %c0_0] : memref<128x128xf32, #tpu.memory_space<vmem>>, vector<128x128xf32>
    %1 = arith.truncf %0 : vector<128x128xf32> to vector<128x128xbf16>
    %c0_1 = arith.constant 0 : index
    %c0_2 = arith.constant 0 : index
    %2 = vector.load %arg2[%c0_1, %c0_2] : memref<128x256xbf16, #tpu.memory_space<vmem>>, vector<128x256xbf16>
    %cst = arith.constant dense<0.000000e+00> : vector<128x256xf32>
    %3 = tpu.matmul %1, %2, %cst {dimension_numbers = #tpu.dot_dimension_numbers<[1], [0], [0], [1], [0, 0, 1, 1], [], []>} : vector<128x128xbf16>, vector<128x256xbf16>, vector<128x256xf32> -> vector<128x256xf32>
    %c0_3 = arith.constant 0 : index
    %c0_4 = arith.constant 0 : index
    %4 = vector.load %arg3[%c0_3, %c0_4] : memref<1x256xf32, #tpu.memory_space<vmem>>, vector<1x256xf32>
    %5 = vector.broadcast %4 : vector<1x256xf32> to vector<128x256xf32>
    %6 = arith.addf %3, %5 : vector<128x256xf32>
    %cst_5 = arith.constant 5.000000e-01 : f32
    %7 = vector.broadcast %cst_5 : f32 to vector<128x256xf32>
    %8 = arith.mulf %7, %6 : vector<128x256xf32>
    %cst_6 = arith.constant 0.707106769 : f32
    %9 = vector.broadcast %cst_6 : f32 to vector<128x256xf32>
    %10 = arith.mulf %6, %9 : vector<128x256xf32>
    %11 = math.erf %10 : vector<128x256xf32>
    %cst_7 = arith.constant 1.000000e+00 : f32
    %12 = vector.broadcast %cst_7 : f32 to vector<128x256xf32>
    %13 = arith.addf %12, %11 : vector<128x256xf32>
    %14 = arith.mulf %8, %13 : vector<128x256xf32>
    %15 = arith.truncf %14 : vector<128x256xf32> to vector<128x256xbf16>
    %c0_8 = arith.constant 0 : index
    %c0_9 = arith.constant 0 : index
    %16 = vector.load %arg4[%c0_8, %c0_9] : memref<256x256xbf16, #tpu.memory_space<vmem>>, vector<256x256xbf16>
    %cst_10 = arith.constant dense<0.000000e+00> : vector<128x256xf32>
    %17 = tpu.matmul %15, %16, %cst_10 {dimension_numbers = #tpu.dot_dimension_numbers<[1], [0], [0], [1], [0, 0, 1, 1], [], []>} : vector<128x256xbf16>, vector<256x256xbf16>, vector<128x256xf32> -> vector<128x256xf32>
    %c0_11 = arith.constant 0 : index
    %c0_12 = arith.constant 0 : index
    %18 = vector.load %arg5[%c0_11, %c0_12] : memref<1x256xf32, #tpu.memory_space<vmem>>, vector<1x256xf32>
    %19 = vector.broadcast %18 : vector<1x256xf32> to vector<128x256xf32>
    %20 = arith.addf %17, %19 : vector<128x256xf32>
    %cst_13 = arith.constant 5.000000e-01 : f32
    %21 = vector.broadcast %cst_13 : f32 to vector<128x256xf32>
    %22 = arith.mulf %21, %20 : vector<128x256xf32>
    %cst_14 = arith.constant 0.707106769 : f32
    %23 = vector.broadcast %cst_14 : f32 to vector<128x256xf32>
    %24 = arith.mulf %20, %23 : vector<128x256xf32>
    %25 = math.erf %24 : vector<128x256xf32>
    %cst_15 = arith.constant 1.000000e+00 : f32
    %26 = vector.broadcast %cst_15 : f32 to vector<128x256xf32>
    %27 = arith.addf %26, %25 : vector<128x256xf32>
    %28 = arith.mulf %22, %27 : vector<128x256xf32>
    %29 = arith.truncf %28 : vector<128x256xf32> to vector<128x256xbf16>
    %c0_16 = arith.constant 0 : index
    %c0_17 = arith.constant 0 : index
    %30 = vector.load %arg6[%c0_16, %c0_17] : memref<256x128xbf16, #tpu.memory_space<vmem>>, vector<256x128xbf16>
    %cst_18 = arith.constant dense<0.000000e+00> : vector<128x128xf32>
    %31 = tpu.matmul %29, %30, %cst_18 {dimension_numbers = #tpu.dot_dimension_numbers<[1], [0], [0], [1], [0, 0, 1, 1], [], []>} : vector<128x256xbf16>, vector<256x128xbf16>, vector<128x128xf32> -> vector<128x128xf32>
    %c0_19 = arith.constant 0 : index
    %c0_20 = arith.constant 0 : index
    %32 = vector.load %arg7[%c0_19, %c0_20] : memref<1x128xf32, #tpu.memory_space<vmem>>, vector<1x128xf32>
    %33 = vector.broadcast %32 : vector<1x128xf32> to vector<128x128xf32>
    %34 = arith.addf %31, %33 : vector<128x128xf32>
    %cst_21 = arith.constant 5.000000e-01 : f32
    %35 = vector.broadcast %cst_21 : f32 to vector<128x128xf32>
    %36 = arith.mulf %35, %34 : vector<128x128xf32>
    %cst_22 = arith.constant 0.707106769 : f32
    %37 = vector.broadcast %cst_22 : f32 to vector<128x128xf32>
    %38 = arith.mulf %34, %37 : vector<128x128xf32>
    %39 = math.erf %38 : vector<128x128xf32>
    %cst_23 = arith.constant 1.000000e+00 : f32
    %40 = vector.broadcast %cst_23 : f32 to vector<128x128xf32>
    %41 = arith.addf %40, %39 : vector<128x128xf32>
    %42 = arith.mulf %36, %41 : vector<128x128xf32>
    %c0_24 = arith.constant 0 : index
    %c0_25 = arith.constant 0 : index
    %43 = vector.load %arg8[%c0_24, %c0_25] : memref<128x128xf32, #tpu.memory_space<vmem>>, vector<128x128xf32>
    tpu.vector_store %arg8[%c0_24, %c0_25], %42 {strides = array<i32>} : memref<128x128xf32, #tpu.memory_space<vmem>>, vector<128x128xf32>,
    return
  }
  func.func @transform_0(%arg0: i32) -> (i32, i32) {
    %c0_i32 = arith.constant 0 : i32
    %c0_i32_0 = arith.constant 0 : i32
    return %arg0, %c0_i32 : i32, i32
  }
  func.func @transform_1(%arg0: i32) -> (i32, i32) {
    %c0_i32 = arith.constant 0 : i32
    %c0_i32_0 = arith.constant 0 : i32
    %c0_i32_1 = arith.constant 0 : i32
    return %c0_i32, %c0_i32_0 : i32, i32
  }
  func.func @transform_2(%arg0: i32) -> (i32, i32) {
    %c0_i32 = arith.constant 0 : i32
    %c0_i32_0 = arith.constant 0 : i32
    %c0_i32_1 = arith.constant 0 : i32
    return %c0_i32, %c0_i32_0 : i32, i32
  }
  func.func @transform_3(%arg0: i32) -> (i32, i32) {
    %c0_i32 = arith.constant 0 : i32
    %c0_i32_0 = arith.constant 0 : i32
    %c0_i32_1 = arith.constant 0 : i32
    return %c0_i32, %c0_i32_0 : i32, i32
  }
  func.func @transform_4(%arg0: i32) -> (i32, i32) {
    %c0_i32 = arith.constant 0 : i32
    %c0_i32_0 = arith.constant 0 : i32
    %c0_i32_1 = arith.constant 0 : i32
    return %c0_i32, %c0_i32_0 : i32, i32
  }
  func.func @transform_5(%arg0: i32) -> (i32, i32) {
    %c0_i32 = arith.constant 0 : i32
    %c0_i32_0 = arith.constant 0 : i32
    %c0_i32_1 = arith.constant 0 : i32
    return %c0_i32, %c0_i32_0 : i32, i32
  }
  func.func @transform_6(%arg0: i32) -> (i32, i32) {
    %c0_i32 = arith.constant 0 : i32
    %c0_i32_0 = arith.constant 0 : i32
    %c0_i32_1 = arith.constant 0 : i32
    return %c0_i32, %c0_i32_0 : i32, i32
  }
  func.func @transform_7(%arg0: i32) -> (i32, i32) {
    %c0_i32 = arith.constant 0 : i32
    %c0_i32_0 = arith.constant 0 : i32
    return %arg0, %c0_i32 : i32, i32
  }
}

</mosaic_0001>

<bundles_post_ra>
// kernel: mlp_forward.1
= control target key start
LH: loop header
LB: loop body
LE: loop exit
PB: predicated region body
PF: predicated region fallthrough
CT: control target
= control target key end

     0   :  { %12 = vsyncpa [#allocation3], 0  ;;  %s2749_s0 = inlined_call_operand.vmem [shape: f32[256,128], index: 0, kind: input, shape index: {}]   ;;  %s2750_s1 = inlined_call_operand.vmem [shape: bf16[128,256], index: 1, kind: input, shape index: {}]   ;;  %s2751_s2 = inlined_call_operand.vmem [shape: f32[1,256], index: 2, kind: input, shape index: {}]   ;;  %s2752_s3 = inlined_call_operand.vmem [shape: bf16[256,256], index: 3, kind: input, shape index: {}]   ;;  %s2753_s4 = inlined_call_operand.vmem [shape: f32[1,256], index: 4, kind: input, shape index: {}]   ;;  %s2754_s5 = inlined_call_operand.vmem [shape: bf16[256,128], index: 5, kind: input, shape index: {}]   ;;  %s2755_s6 = inlined_call_operand.vmem [shape: f32[1,128], index: 6, kind: input, shape index: {}]   ;;  %s2756_s7 = inlined_call_operand.hbm [shape: f32[256,128], index: 7, kind: output, shape index: {}]  }
   0x1   :  { %14 = vsyncpa [#allocation3 + $0x1], 0  ;;  %s2155_s24 = smov 0   ;;  %s2157_s25 = smov 0  }
   0x2   :  { %s2159_s26 = smov 0   ;;  %s2161_s27 = smov 0  }
   0x3 LB: > { %s2176_s28 = sadd.s32 4294967295, %s2109_s27   ;;  %s1599_s29 = sadd.s32 4294967294, %s2109_s27   ;;  %s2109_s27 = sphi %s2161_s27, %s2762_s27   ;;  %s2105_s26 = sphi %s2159_s26, %s2761_s26   ;;  %s2101_s25 = sphi %s2157_s25, %s2760_s25   ;;  %s2097_s24 = sphi %s2155_s24, %s2759_s24  }
   0x4   : > { %s2180_s30 = sadd.s32 1, %s2109_s27   ;;  %s179_s8 = sadd.s32 1, %s2105_s26 }
   0x5   : > { %s176_s9 = ssub.s32 %s2109_s27, %s2180_s30  ;;  %p189_p0 = scmp.ne.s32.totalorder %s2105_s26, %s2101_s25 }
   0x6   : > { %p177_p1 = scmp.eq.s32.totalorder %s176_s9, 0  ;;  %p190_p2 = scmp.eq.s32.totalorder %s2176_s28, 1 }
   0x7   : > { %p195_p3 = scmp.ne.s32.totalorder %s2101_s25, %s2097_s24  ;;  %p196_p4 = scmp.eq.s32.totalorder %s1599_s29, 1 }
   0x8   : > { %s2191_s10 = scalar_select %p177_p1, %s2105_s26, %s179_s8  }
   0x9   : > { %p2193_p5 = por %p190_p2, %p189_p0  ;;  %p2197_p6 = por %p196_p4, %p195_p3 }
   0xa   : > { %p1602_p7 = scmp.ge.s32.totalorder %s2109_s27, 1  ;;  %p241_p8 = scmp.lt.s32.totalorder %s2109_s27, 3 }
   0xc   : > { %p242_p9 = pnand %p1602_p7, %p241_p8 }
   0xd   : > { %v1799_v0 = vld [vmem:[%s2750_s1 + $0x4] ss:$8 sps:$4 sm:$0xff] (!%p242_p9)   ;;  %v1801_v1 = vld [vmem:[%s2750_s1] ss:$8 sps:$4 sm:$0xff] (!%p242_p9)   ;;  %v2111_v2 = vmov (!%p242_p9), 0   ;;  %s1604_s13 = sshll.u32 (!%p242_p9), %s2176_s28, 4 }
   0xe   : > { %245 = sbr.rel (%p242_p9) target bundleno = 827 (0x33b), region = 48  ;;  %445 = vmatprep.mubr.bf16.mxu0 (!%p242_p9), %v2111_v2  ;;  %413 = vmatprep.subr.bf16.mxu0 (!%p242_p9), %v1799_v0  ;;  %v1802_v3 = vld [vmem:[%s2750_s1 + $0x14] ss:$8 sps:$4 sm:$0xff] (!%p242_p9)   ;;  %v1804_v4 = vld [vmem:[%s2750_s1 + $0x10] ss:$8 sps:$4 sm:$0xff] (!%p242_p9)   ;;  %p274_p10 = scmp.lt.s32.totalorder (!%p242_p9), %s1604_s13, 31 }
   0xf   : > { %414 = vmatpush1.bf16.msra.mxu0 (!%p242_p9), %v1801_v1  ;;  %v1805_v5 = vld [vmem:[%s2750_s1 + $0x24] ss:$8 sps:$4 sm:$0xff] (!%p242_p9)   ;;  %v1807_v6 = vld [vmem:[%s2750_s1 + $0x20] ss:$8 sps:$4 sm:$0xff] (!%p242_p9)   ;;  %v1808_v7 = vld [vmem:[%s2750_s1 + $0x34] ss:$8 sps:$4 sm:$0xff] (!%p242_p9)  }
  0x10   : > { %415 = vmatprep.subr.bf16.mxu0 (!%p242_p9), %v1802_v3  ;;  %v1810_v8 = vld [vmem:[%s2750_s1 + $0x30] ss:$8 sps:$4 sm:$0xff] (!%p242_p9)   ;;  %v1811_v9 = vld [vmem:[%s2750_s1 + $0x44] ss:$8 sps:$4 sm:$0xff] (!%p242_p9)   ;;  %v1813_v10 = vld [vmem:[%s2750_s1 + $0x40] ss:$8 sps:$4 sm:$0xff] (!%p242_p9)  }
  0x11   : > { %v1814_v11 = vld [vmem:[%s2750_s1 + $0x54] ss:$8 sps:$4 sm:$0xff] (!%p242_p9)   ;;  %v1823_v12 = vld [vmem:[%s2752_s3 + $0x4] ss:$8 sps:$4 sm:$0xff] (!%p242_p9)   ;;  %v1825_v13 = vld [vmem:[%s2752_s3] ss:$8 sps:$4 sm:$0xff] (!%p242_p9)  }
  0x12   : > { %v1816_v14 = vld [vmem:[%s2750_s1 + $0x50] ss:$8 sps:$4 sm:$0xff] (!%p242_p9)   ;;  %906 = vmatprep.subr.bf16.mxu1 (!%p242_p9), %v1823_v12  ;;  %v1826_v15 = vld [vmem:[%s2752_s3 + $0x14] ss:$8 sps:$4 sm:$0xff] (!%p242_p9)   ;;  %v1817_v16 = vld [vmem:[%s2750_s1 + $0x64] ss:$8 sps:$4 sm:$0xff] (!%p242_p9)  }
  0x13   : > { %416 = vmatpush1.bf16.msra.mxu0 (!%p242_p9), %v1804_v4  ;;  %907 = vmatpush1.bf16.msra.mxu1 (!%p242_p9), %v1825_v13  ;;  %v1828_v17 = vld [vmem:[%s2752_s3 + $0x10] ss:$8 sps:$4 sm:$0xff] (!%p242_p9)   ;;  %v1829_v18 = vld [vmem:[%s2752_s3 + $0x24] ss:$8 sps:$4 sm:$0xff] (!%p242_p9)   ;;  %v1819_v19 = vld [vmem:[%s2750_s1 + $0x60] ss:$8 sps:$4 sm:$0xff] (!%p242_p9)  }
  0x14   : > { %417 = vmatprep.subr.bf16.mxu0 (!%p242_p9), %v1805_v5  ;;  %908 = vmatprep.subr.bf16.mxu1 (!%p242_p9), %v1826_v15  ;;  %v1820_v20 = vld [vmem:[%s2750_s1 + $0x74] ss:$8 sps:$4 sm:$0xff] (!%p242_p9)   ;;  %v1831_v21 = vld [vmem:[%s2752_s3 + $0x20] ss:$8 sps:$4 sm:$0xff] (!%p242_p9)   ;;  %v1822_v23 = vld [vmem:[%s2750_s1 + $0x70] ss:$8 sps:$4 sm:$0xff] (!%p242_p9)   ;;  %v323_v15 = vlaneseq (!%p242_p9) }
  0x15   : > { %s2764_s13 = smov (!%p274_p10, %s1604_s13), 31  ;;  %v1832_v22 = vld [vmem:[%s2752_s3 + $0x34] ss:$8 sps:$4 sm:$0xff]   ;;  %v1834_v26 = vld [vmem:[%s2752_s3 + $0x30] ss:$8 sps:$4 sm:$0xff]   ;;  %v2394_v12 = vld [vmem:[%s2754_s5 + $0x8] sm:$0xff]  }
  0x16   : > { %s1605_s21 = sshll.u32 %s2764_s13, 3  ;;  %v1835_v27 = vld [vmem:[%s2752_s3 + $0x44] ss:$8 sps:$4 sm:$0xff]   ;;  %v1837_v28 = vld [vmem:[%s2752_s3 + $0x40] ss:$8 sps:$4 sm:$0xff]   ;;  %v2400_v13 = vld [vmem:[%s2754_s5 + $0x50] sm:$0xff]  }
  0x17   : > { %418 = vmatpush1.bf16.msra.mxu0 %v1807_v6  ;;  %s2268_s17 = scalar_lea.vmem %s2749_s0, %s1605_s21  ;;  %909 = vmatpush1.bf16.msra.mxu1 %v1828_v17  ;;  %v1838_v30 = vld [vmem:[%s2752_s3 + $0x54] ss:$8 sps:$4 sm:$0xff]   ;;  %v1840_v33 = vld [vmem:[%s2752_s3 + $0x50] ss:$8 sps:$4 sm:$0xff]   ;;  %v1841_v34 = vld [vmem:[%s2752_s3 + $0x64] ss:$8 sps:$4 sm:$0xff]  }
  0x18   : > { %419 = vmatprep.subr.bf16.mxu0 %v1808_v7  ;;  %910 = vmatprep.subr.bf16.mxu1 %v1829_v18  ;;  %v281_v24 = vld [vmem:[%s2268_s17] sm:$0xff]  ;;  %v282_v25 = vld [vmem:[%s2268_s17 + $0x8] sm:$0xff]  ;;  %v283_v31 = vld [vmem:[%s2268_s17 + $0x10] sm:$0xff]  ;;  %s270_s16 = sand.u32 1, %s2101_s25   ;;  %s1676_s18 = sshll.u32 %s2176_s28, 11 }
  0x19   : > { %v297_v29 = vpack.c.bf16 %v282_v25, %v281_v24  ;;  %v284_v32 = vld [vmem:[%s2268_s17 + $0x18] sm:$0xff]  ;;  %v1843_v35 = vld [vmem:[%s2752_s3 + $0x60] ss:$8 sps:$4 sm:$0xff]   ;;  %v1847_v41 = vld [vmem:[%s2752_s3 + $0x84] ss:$8 sps:$4 sm:$0xff]   ;;  %s1603_s13 = sshll.u32 %s270_s16, 7  ;;  %s2700_s23 = scalar_lea.hbm %s2756_s7, %s1676_s18 }
  0x1a   : > { %v298_v36 = vpack.c.bf16 %v284_v32, %v283_v31  ;;  %v1844_v37 = vld [vmem:[%s2752_s3 + $0x74] ss:$8 sps:$4 sm:$0xff]   ;;  %v285_v38 = vld [vmem:[%s2268_s17 + $0x20] sm:$0xff]  ;;  %v286_v39 = vld [vmem:[%s2268_s17 + $0x28] sm:$0xff]  ;;  %s2708_s28 = scalar_lea.sflag [#allocation3], %s270_s16  ;;  %s2112_s29 = smov [#allocation2]  }
  0x1b   : > { %420 = vmatpush1.bf16.msra.mxu0 %v1810_v8  ;;  %911 = vmatpush1.bf16.msra.mxu1 %v1831_v21  ;;  %v1846_v40 = vld [vmem:[%s2752_s3 + $0x70] ss:$8 sps:$4 sm:$0xff]   ;;  %v299_v42 = vpack.c.bf16 %v286_v39, %v285_v38  ;;  %v1849_v43 = vld [vmem:[%s2752_s3 + $0x80] ss:$8 sps:$4 sm:$0xff]   ;;  %v1850_v44 = vld [vmem:[%s2752_s3 + $0x94] ss:$8 sps:$4 sm:$0xff]  }
  0x1c   : > { %421 = vmatprep.subr.bf16.mxu0 %v1811_v9  ;;  %912 = vmatprep.subr.bf16.mxu1 %v1832_v22  ;;  %v287_v45 = vld [vmem:[%s2268_s17 + $0x30] sm:$0xff]  ;;  %v288_v46 = vld [vmem:[%s2268_s17 + $0x38] sm:$0xff]  ;;  %v289_v49 = vld [vmem:[%s2268_s17 + $0x40] sm:$0xff]  ;;  %s2051_s8 = sshll.u32 %s2112_s29, 4  ;;  %s2052_s8 = int_to_ptr.vmem [resolvable:$false] %s2051_s8 }
  0x1d   : > { %v1852_v47 = vld [vmem:[%s2752_s3 + $0x90] ss:$8 sps:$4 sm:$0xff]   ;;  %v300_v48 = vpack.c.bf16 %v288_v46, %v287_v45  ;;  %v290_v50 = vld [vmem:[%s2268_s17 + $0x48] sm:$0xff]  ;;  %v293_v55 = vld [vmem:[%s2268_s17 + $0x60] sm:$0xff]  ;;  %s2053_s9 = scalar_lea.vmem %s2052_s8, 4096 }
  0x1e   : > { %v301_v51 = vpack.c.bf16 %v290_v50, %v289_v49  ;;  %v291_v52 = vld [vmem:[%s2268_s17 + $0x50] sm:$0xff]  ;;  %v292_v53 = vld [vmem:[%s2268_s17 + $0x58] sm:$0xff]  ;;  %v294_v56 = vld [vmem:[%s2268_s17 + $0x68] sm:$0xff] }
  0x1f   : > { %422 = vmatpush1.bf16.msra.mxu0 %v1813_v10  ;;  %913 = vmatpush1.bf16.msra.mxu1 %v1834_v26  ;;  %v302_v54 = vpack.c.bf16 %v292_v53, %v291_v52  ;;  %v303_v57 = vpack.c.bf16 %v294_v56, %v293_v55  ;;  %v295_v58 = vld [vmem:[%s2268_s17 + $0x70] sm:$0xff]  ;;  %v296_v59 = vld [vmem:[%s2268_s17 + $0x78] sm:$0xff]  ;;  %v1853_v61 = vld [vmem:[%s2752_s3 + $0xa4] ss:$8 sps:$4 sm:$0xff]   ;;  %s2668_s17 = scalar_lea.vmem [#allocation2], %s1603_s13 }
  0x20   : > { %423 = vmatprep.subr.bf16.mxu0 %v1814_v11  ;;  %914 = vmatprep.subr.bf16.mxu1 %v1835_v27  ;;  %v304_v60 = vpack.c.bf16 %v296_v59, %v295_v58  ;;  %v1855_v62 = vld [vmem:[%s2752_s3 + $0xa0] ss:$8 sps:$4 sm:$0xff]   ;;  %v1856_v63 = vld [vmem:[%s2752_s3 + $0xb4] ss:$8 sps:$4 sm:$0xff]   ;;  %v1858_v0 = vld [vmem:[%s2752_s3 + $0xb0] ss:$8 sps:$4 sm:$0xff]  }
  0x21   : > { %v1859_v1 = vld [vmem:[%s2752_s3 + $0xc4] ss:$8 sps:$4 sm:$0xff]   ;;  %v1862_v3 = vld [vmem:[%s2752_s3 + $0xd4] ss:$8 sps:$4 sm:$0xff]   ;;  %v1864_v4 = vld [vmem:[%s2752_s3 + $0xd0] ss:$8 sps:$4 sm:$0xff]  }
  0x22   : > { %v1865_v5 = vld [vmem:[%s2752_s3 + $0xe4] ss:$8 sps:$4 sm:$0xff]   ;;  %v1867_v6 = vld [vmem:[%s2752_s3 + $0xe0] ss:$8 sps:$4 sm:$0xff]   ;;  %v1868_v7 = vld [vmem:[%s2752_s3 + $0xf4] ss:$8 sps:$4 sm:$0xff]  }
  0x23   : > { %424 = vmatpush1.bf16.msra.mxu0 %v1816_v14  ;;  %915 = vmatpush1.bf16.msra.mxu1 %v1837_v28  ;;  %v1870_v8 = vld [vmem:[%s2752_s3 + $0xf0] ss:$8 sps:$4 sm:$0xff]   ;;  %v1871_v9 = vld [vmem:[%s2754_s5 + $0x40] sm:$0xff]   ;;  %v2388_v11 = vld [vmem:[%s2754_s5 + $0x48] sm:$0xff]   ;;  %s1537_s19 = sshll.u32 %s2668_s17, 4  ;;  %s2702_s19 = int_to_ptr.vmem [resolvable:$true] %s1537_s19 }
  0x24   : > { %425 = vmatprep.subr.bf16.mxu0 %v1817_v16  ;;  %916 = vmatprep.subr.bf16.mxu1 %v1838_v30  ;;  %v2383_v10 = vld [vmem:[%s2754_s5] sm:$0xff]   ;;  %v2406_v14 = vld [vmem:[%s2754_s5 + $0x10] sm:$0xff]   ;;  %v2410_v16 = vshrl.u32 %v323_v15, 7  ;;  %s2047_s21 = scalar_lea.vmem %s2702_s19, 2048  ;;  %p2054_p0 = scmp.lt.s32.totalorder %s2702_s19, %s2052_s8 }
  0x25   : > { %v321_v18 = vld [vmem:[%s2751_s2] sm:$0x3]  ;;  %p2048_p11 = scmp.ne.s32.totalorder %s2702_s19, %s2047_s21  ;;  %p2055_p1 = scmp.lt.s32.totalorder %s2053_s9, %s2047_s21 }
  0x26   : > { %v325_v17 = vsub.s32 0, %v2410_v16 }
  0x27   : > { %426 = vmatpush1.bf16.msra.mxu0 %v1819_v19  ;;  %917 = vmatpush1.bf16.msra.mxu1 %v1840_v33  ;;  %v329_v19 = vsub.s32 1, %v2410_v16  ;;  %p2049_p12 = pnand %p2048_p11, %p2193_p5  ;;  %p2056_p2 = por %p2055_p1, %p2054_p0 }
  0x28   : > { %427 = vmatprep.subr.bf16.mxu0 %v1820_v20  ;;  %918 = vmatprep.subr.bf16.mxu1 %v1841_v34  ;;  %v2419_v20 = vrot.slane %v321_v18, %v325_v17 }
  0x29   : > { %v2423_v21 = vrot.slane %v321_v18, %v329_v19  ;;  %p2050_p13 = pneg %p2049_p12 }
  0x2b   : > { %428 = vmatpush1.bf16.msra.mxu0 %v1822_v23  ;;  %919 = vmatpush1.bf16.msra.mxu1 %v1843_v35  ;;  %p2057_p3 = pnand %p2056_p2, %p2050_p13 }
  0x2c   : > { %920 = vmatprep.subr.bf16.mxu1 %v1844_v37  ;;  %1677 = vmatprep.subr.bf16.mxu0 %v1871_v9 }
  0x2e   : > { %446 = vmatmul.mubr.bf16.vlgmr.msra.gmra.mrb[0].mxu0 %v297_v29 }
  0x2f   : > { %455 = vmatprep.mubr.bf16.mxu0 %v2111_v2  ;;  %921 = vmatpush1.bf16.msra.mxu1 %v1846_v40 }
  0x30   : > { %922 = vmatprep.subr.bf16.mxu1 %v1847_v41  ;;  %1678 = vmatpush3.bf16.msra.mxu0 %v2383_v10 }
  0x31   : > { %1679 = vmatprep.subr.bf16.mxu0 %v2388_v11 }
  0x33   : > { %923 = vmatpush1.bf16.msra.mxu1 %v1849_v43 }
  0x34   : > { %924 = vmatprep.subr.bf16.mxu1 %v1850_v44  ;;  %1680 = vmatpush3.bf16.msra.mxu0 %v2394_v12 }
  0x35   : > { %1681 = vmatprep.subr.bf16.mxu0 %v2400_v13 }
  0x36   : > { %456 = vmatmul.mubr.bf16.gmra.mrb[4].mxu0 %v298_v36 }
  0x37   : > { %465 = vmatprep.mubr.bf16.mxu0 %v2111_v2  ;;  %925 = vmatpush1.bf16.msra.mxu1 %v1852_v47 }
  0x38   : > { %926 = vmatprep.subr.bf16.mxu1 %v1853_v61  ;;  %1682 = vmatpush3.bf16.msra.mxu0 %v2406_v14 }
  0x3b   : > { %927 = vmatpush1.bf16.msra.mxu1 %v1855_v62 }
  0x3c   : > { %928 = vmatprep.subr.bf16.mxu1 %v1856_v63 }
  0x3e   : > { %466 = vmatmul.mubr.bf16.gmra.mrb[8].mxu0 %v299_v42 }
  0x3f   : > { %475 = vmatprep.mubr.bf16.mxu0 %v2111_v2  ;;  %929 = vmatpush1.bf16.msra.mxu1 %v1858_v0 }
  0x40   : > { %930 = vmatprep.subr.bf16.mxu1 %v1859_v1 }
  0x46   : > { %476 = vmatmul.mubr.bf16.gmra.mrb[12].mxu0 %v300_v48 }
  0x47   : > { %485 = vmatprep.mubr.bf16.mxu0 %v2111_v2 }
  0x4e   : > { %486 = vmatmul.mubr.bf16.gmra.mrb[16].mxu0 %v301_v51 }
  0x4f   : > { %495 = vmatprep.mubr.bf16.mxu0 %v2111_v2 }
  0x56   : > { %496 = vmatmul.mubr.bf16.gmra.mrb[20].mxu0 %v302_v54 }
  0x57   : > { %505 = vmatprep.mubr.bf16.mxu0 %v2111_v2 }
  0x5e   : > { %506 = vmatmul.mubr.bf16.gmra.mrb[24].mxu0 %v303_v57 }
  0x5f   : > { %515 = vmatprep.mubr.bf16.mxu0 %v2111_v2  ;;  %v1861_v2 = vld [vmem:[%s2752_s3 + $0xc0] ss:$8 sps:$4 sm:$0xff]  }
  0x60   : > { %931 = vmatpush1.bf16.msra.mxu1 %v1861_v2 }
  0x61   : > { %932 = vmatprep.subr.bf16.mxu1 %v1862_v3 }
  0x64   : > { %933 = vmatpush1.bf16.msra.mxu1 %v1864_v4 }
  0x65   : > { %934 = vmatprep.subr.bf16.mxu1 %v1865_v5 }
  0x66   : > { %516 = vmatmul.mubr.bf16.gmra.mrb[28].mxu0 %v304_v60 }
  0x68   : > { %935 = vmatpush1.bf16.msra.mxu1 %v1867_v6 }
  0x69   : > { %936 = vmatprep.subr.bf16.mxu1 %v1868_v7 }
  0x6c   : > { %937 = vmatpush1.bf16.msra.mxu1 %v1870_v8 }
  0x6d   : > { %1741 = vmatprep.subr.bf16.mxu1 %v1871_v9 }
 0x101   : > { %v447_v22 = vpop.f32.mrb[0].mxu0 }
 0x102   : > { %v448_v23 = vadd.f32 %v447_v22, %v2419_v20  ;;  %v449_v24 = vpop.f32.mrb[1].mxu0 }
 0x103   : > { %v450_v25 = vadd.f32 %v449_v24, %v2423_v21  ;;  %v451_v26 = vpop.f32.mrb[2].mxu0 }
 0x104   : > { %v558_v27 = vmul.f32 0.70710677, %v448_v23  ;;  %v452_v28 = vadd.f32 %v451_v26, %v2419_v20  ;;  %v453_v29 = vpop.f32.mrb[3].mxu0  ;;  %v526_v50 = vmul.f32 0.5, %v448_v23 }
 0x105   : > { %v559_v30 = vmul.f32 0.70710677, %v450_v25  ;;  %v454_v31 = vadd.f32 %v453_v29, %v2423_v21  ;;  %v527_v60 = vmul.f32 0.5, %v450_v25 }
 0x106   : > { %1887 = verf.f32 %v558_v27  ;;  %v560_v32 = vmul.f32 0.70710677, %v452_v28  ;;  %v528_v55 = vmul.f32 0.5, %v452_v28 }
 0x107   : > { %1889 = verf.f32 %v559_v30  ;;  %v561_v33 = vmul.f32 0.70710677, %v454_v31  ;;  %v529_v2 = vmul.f32 0.5, %v454_v31 }
 0x108   : > { %1891 = verf.f32 %v560_v32 }
 0x109   : > { %1893 = verf.f32 %v561_v33  ;;  %v457_v34 = vpop.f32.mrb[4].mxu0 }
 0x10a   : > { %v458_v35 = vadd.f32 %v457_v34, %v2419_v20  ;;  %v459_v36 = vpop.f32.mrb[5].mxu0 }
 0x10b   : > { %v460_v37 = vadd.f32 %v459_v36, %v2423_v21  ;;  %v461_v38 = vpop.f32.mrb[6].mxu0 }
 0x10c   : > { %v562_v39 = vmul.f32 0.70710677, %v458_v35  ;;  %v462_v40 = vadd.f32 %v461_v38, %v2419_v20  ;;  %v463_v41 = vpop.f32.mrb[7].mxu0  ;;  %v530_v31 = vmul.f32 0.5, %v458_v35 }
 0x10d   : > { %v563_v42 = vmul.f32 0.70710677, %v460_v37  ;;  %v464_v43 = vadd.f32 %v463_v41, %v2423_v21  ;;  %v531_v38 = vmul.f32 0.5, %v460_v37 }
 0x10e   : > { %1895 = verf.f32 %v562_v39  ;;  %v564_v44 = vmul.f32 0.70710677, %v462_v40  ;;  %v532_v32 = vmul.f32 0.5, %v462_v40 }
 0x10f   : > { %1897 = verf.f32 %v563_v42  ;;  %v565_v45 = vmul.f32 0.70710677, %v464_v43  ;;  %v533_v39 = vmul.f32 0.5, %v464_v43 }
 0x110   : > { %v1888_v46 = vpop.eup %1887  ;;  %1899 = verf.f32 %v564_v44 }
 0x111   : > { %v1890_v47 = vpop.eup %1889  ;;  %1901 = verf.f32 %v565_v45  ;;  %v467_v48 = vpop.f32.mrb[8].mxu0  ;;  %v622_v51 = vadd.f32 1.0, %v1888_v46 }
 0x112   : > { %v1892_v49 = vpop.eup %1891  ;;  %v2434_v52 = vadd.f32 %v467_v48, %v2419_v20  ;;  %v469_v53 = vpop.f32.mrb[9].mxu0  ;;  %v623_v59 = vadd.f32 1.0, %v1890_v47 }
 0x113   : > { %v1894_v54 = vpop.eup %1893  ;;  %v624_v56 = vadd.f32 1.0, %v1892_v49  ;;  %v2437_v57 = vadd.f32 %v469_v53, %v2423_v21  ;;  %v471_v58 = vpop.f32.mrb[10].mxu0  ;;  %v654_v5 = vmul.f32 %v622_v51, %v526_v50 }
 0x114   : > { %v566_v61 = vmul.f32 0.70710677, %v2434_v52  ;;  %v2441_v62 = vadd.f32 %v471_v58, %v2419_v20  ;;  %v473_v63 = vpop.f32.mrb[11].mxu0  ;;  %v625_v0 = vadd.f32 1.0, %v1894_v54  ;;  %v655_v8 = vmul.f32 %v623_v59, %v527_v60 }
 0x115   : > { %v656_v1 = vmul.f32 %v624_v56, %v528_v55  ;;  %v567_v3 = vmul.f32 0.70710677, %v2437_v57  ;;  %v2445_v4 = vadd.f32 %v473_v63, %v2423_v21 }
 0x116   : > { %1903 = verf.f32 %v566_v61  ;;  %v568_v6 = vmul.f32 0.70710677, %v2441_v62  ;;  %v657_v9 = vmul.f32 %v625_v0, %v529_v2  ;;  %v534_v61 = vmul.f32 0.5, %v2434_v52 }
 0x117   : > { %1905 = verf.f32 %v567_v3  ;;  %v569_v7 = vmul.f32 0.70710677, %v2445_v4  ;;  %v686_v18 = vpack.c.bf16 %v656_v1, %v654_v5  ;;  %v536_v63 = vmul.f32 0.5, %v2441_v62 }
 0x118   : > { %v1896_v15 = vpop.eup %1895  ;;  %1907 = verf.f32 %v568_v6  ;;  %v687_v25 = vpack.c.bf16 %v657_v9, %v655_v8  ;;  %v535_v2 = vmul.f32 0.5, %v2437_v57  ;;  %v537_v3 = vmul.f32 0.5, %v2445_v4 }
 0x119   : > { %v1898_v22 = vpop.eup %1897  ;;  %v626_v23 = vadd.f32 1.0, %v1896_v15  ;;  %1909 = verf.f32 %v569_v7  ;;  %v477_v24 = vpop.f32.mrb[12].mxu0 }
 0x11a   : > { %v1900_v26 = vpop.eup %1899  ;;  %v627_v27 = vadd.f32 1.0, %v1898_v22  ;;  %v2450_v28 = vadd.f32 %v477_v24, %v2419_v20  ;;  %v479_v29 = vpop.f32.mrb[13].mxu0  ;;  %938 = vmatprep.mubr.bf16.mxu1 %v687_v25 }
 0x11b   : > { %v1902_v30 = vpop.eup %1901  ;;  %v628_v33 = vadd.f32 1.0, %v1900_v26  ;;  %v2453_v34 = vadd.f32 %v479_v29, %v2423_v21  ;;  %v481_v36 = vpop.f32.mrb[14].mxu0  ;;  %939 = vmatmul.mubr.bf16.vlgmr.msra.gmra.mrb[0].mxu1 %v686_v18  ;;  %v658_v45 = vmul.f32 %v626_v23, %v530_v31 }
 0x11c   : > { %v629_v41 = vadd.f32 1.0, %v1902_v30  ;;  %v570_v42 = vmul.f32 0.70710677, %v2450_v28  ;;  %v483_v44 = vpop.f32.mrb[15].mxu0  ;;  %v2458_v35 = vadd.f32 %v481_v36, %v2419_v20  ;;  %1749 = vmatpush3.bf16.msra.mxu1 %v2383_v10  ;;  %v659_v40 = vmul.f32 %v627_v27, %v531_v38 }
 0x11d   : > { %v660_v46 = vmul.f32 %v628_v33, %v532_v32  ;;  %v571_v47 = vmul.f32 0.70710677, %v2453_v34  ;;  %v2462_v37 = vadd.f32 %v483_v44, %v2423_v21  ;;  %1742 = vmatprep.subr.bf16.mxu1 %v2388_v11  ;;  %v538_v31 = vmul.f32 0.5, %v2450_v28 }
 0x11e   : > { %v661_v48 = vmul.f32 %v629_v41, %v533_v39  ;;  %1911 = verf.f32 %v570_v42  ;;  %v572_v43 = vmul.f32 0.70710677, %v2458_v35  ;;  %v539_v39 = vmul.f32 0.5, %v2453_v34 }
 0x11f   : > { %1913 = verf.f32 %v571_v47  ;;  %v688_v49 = vpack.c.bf16 %v660_v46, %v658_v45  ;;  %v573_v51 = vmul.f32 0.70710677, %v2462_v37  ;;  %v540_v41 = vmul.f32 0.5, %v2458_v35 }
 0x120   : > { %v1904_v50 = vpop.eup %1903  ;;  %v689_v53 = vpack.c.bf16 %v661_v48, %v659_v40  ;;  %1915 = verf.f32 %v572_v43  ;;  %1750 = vmatpush3.bf16.msra.mxu1 %v2394_v12  ;;  %v541_v46 = vmul.f32 0.5, %v2462_v37 }
 0x121   : > { %v1906_v54 = vpop.eup %1905  ;;  %v630_v55 = vadd.f32 1.0, %v1904_v50  ;;  %v487_v10 = vpop.f32.mrb[16].mxu0  ;;  %1917 = verf.f32 %v573_v51  ;;  %1743 = vmatprep.subr.bf16.mxu1 %v2400_v13 }
 0x122   : > { %v1908_v56 = vpop.eup %1907  ;;  %v631_v58 = vadd.f32 1.0, %v1906_v54  ;;  %v2469_v59 = vadd.f32 %v487_v10, %v2419_v20  ;;  %v489_v11 = vpop.f32.mrb[17].mxu0  ;;  %948 = vmatprep.mubr.bf16.mxu1 %v689_v53 }
 0x123   : > { %v1910_v60 = vpop.eup %1909  ;;  %v632_v0 = vadd.f32 1.0, %v1908_v56  ;;  %v2475_v1 = vadd.f32 %v489_v11, %v2423_v21  ;;  %v491_v12 = vpop.f32.mrb[18].mxu0  ;;  %949 = vmatmul.mubr.bf16.gmra.mrb[4].mxu1 %v688_v49  ;;  %v662_v13 = vmul.f32 %v630_v55, %v534_v61 }
 0x124   : > { %v633_v5 = vadd.f32 1.0, %v1910_v60  ;;  %v574_v6 = vmul.f32 0.70710677, %v2469_v59  ;;  %v493_v7 = vpop.f32.mrb[19].mxu0  ;;  %v492_v62 = vadd.f32 %v491_v12, %v2419_v20  ;;  %1751 = vmatpush3.bf16.msra.mxu1 %v2406_v14  ;;  %v663_v9 = vmul.f32 %v631_v58, %v535_v2 }
 0x125   : > { %v664_v8 = vmul.f32 %v632_v0, %v536_v63  ;;  %v575_v52 = vmul.f32 0.70710677, %v2475_v1  ;;  %v494_v57 = vadd.f32 %v493_v7, %v2423_v21  ;;  %v542_v61 = vmul.f32 0.5, %v2469_v59 }
 0x126   : > { %v665_v15 = vmul.f32 %v633_v5, %v537_v3  ;;  %1919 = verf.f32 %v574_v6  ;;  %v576_v4 = vmul.f32 0.70710677, %v492_v62  ;;  %v543_v3 = vmul.f32 0.5, %v2475_v1 }
 0x127   : > { %1921 = verf.f32 %v575_v52  ;;  %v690_v18 = vpack.c.bf16 %v664_v8, %v662_v13  ;;  %v577_v23 = vmul.f32 0.70710677, %v494_v57  ;;  %v544_v5 = vmul.f32 0.5, %v492_v62 }
 0x128   : > { %v1912_v22 = vpop.eup %1911  ;;  %v691_v24 = vpack.c.bf16 %v665_v15, %v663_v9  ;;  %1923 = verf.f32 %v576_v4  ;;  %v545_v8 = vmul.f32 0.5, %v494_v57 }
 0x129   : > { %v1914_v25 = vpop.eup %1913  ;;  %v497_v26 = vpop.f32.mrb[20].mxu0  ;;  %v634_v27 = vadd.f32 1.0, %v1912_v22  ;;  %1925 = verf.f32 %v577_v23 }
 0x12a   : > { %v2485_v29 = vadd.f32 %v497_v26, %v2419_v20  ;;  %v499_v14 = vpop.f32.mrb[21].mxu0  ;;  %958 = vmatprep.mubr.bf16.mxu1 %v691_v24  ;;  %v1916_v30 = vpop.eup %1915  ;;  %v635_v32 = vadd.f32 1.0, %v1914_v25 }
 0x12b   : > { %v2489_v33 = vadd.f32 %v499_v14, %v2423_v21  ;;  %v501_v36 = vpop.f32.mrb[22].mxu0  ;;  %v1918_v38 = vpop.eup %1917  ;;  %v636_v42 = vadd.f32 1.0, %v1916_v30  ;;  %959 = vmatmul.mubr.bf16.gmra.mrb[8].mxu1 %v690_v18  ;;  %v666_v48 = vmul.f32 %v634_v27, %v538_v31 }
 0x12c   : > { %v578_v44 = vmul.f32 0.70710677, %v2485_v29  ;;  %v503_v45 = vpop.f32.mrb[23].mxu0  ;;  %v637_v47 = vadd.f32 1.0, %v1918_v38  ;;  %v2497_v40 = vadd.f32 %v501_v36, %v2419_v20  ;;  %v667_v35 = vmul.f32 %v635_v32, %v539_v39 }
 0x12d   : > { %v579_v28 = vmul.f32 0.70710677, %v2489_v33  ;;  %v668_v43 = vmul.f32 %v636_v42, %v540_v41  ;;  %v2500_v34 = vadd.f32 %v503_v45, %v2423_v21  ;;  %v546_v36 = vmul.f32 0.5, %v2485_v29 }
 0x12e   : > { %1927 = verf.f32 %v578_v44  ;;  %v669_v49 = vmul.f32 %v637_v47, %v541_v46  ;;  %v580_v50 = vmul.f32 0.70710677, %v2497_v40  ;;  %v547_v44 = vmul.f32 0.5, %v2489_v33 }
 0x12f   : > { %1929 = verf.f32 %v579_v28  ;;  %v581_v37 = vmul.f32 0.70710677, %v2500_v34  ;;  %v692_v53 = vpack.c.bf16 %v668_v43, %v666_v48  ;;  %v548_v45 = vmul.f32 0.5, %v2497_v40 }
 0x130   : > { %v1920_v51 = vpop.eup %1919  ;;  %1931 = verf.f32 %v580_v50  ;;  %v693_v10 = vpack.c.bf16 %v669_v49, %v667_v35  ;;  %v549_v48 = vmul.f32 0.5, %v2500_v34 }
 0x131   : > { %v1922_v54 = vpop.eup %1921  ;;  %v507_v55 = vpop.f32.mrb[24].mxu0  ;;  %v638_v56 = vadd.f32 1.0, %v1920_v51  ;;  %1933 = verf.f32 %v581_v37 }
 0x132   : > { %v2505_v58 = vadd.f32 %v507_v55, %v2419_v20  ;;  %v509_v11 = vpop.f32.mrb[25].mxu0  ;;  %v1924_v60 = vpop.eup %1923  ;;  %v639_v63 = vadd.f32 1.0, %v1922_v54  ;;  %968 = vmatprep.mubr.bf16.mxu1 %v693_v10 }
 0x133   : > { %v2509_v0 = vadd.f32 %v509_v11, %v2423_v21  ;;  %v511_v12 = vpop.f32.mrb[26].mxu0  ;;  %v1926_v2 = vpop.eup %1925  ;;  %v640_v6 = vadd.f32 1.0, %v1924_v60  ;;  %969 = vmatmul.mubr.bf16.gmra.mrb[12].mxu1 %v692_v53  ;;  %v670_v15 = vmul.f32 %v638_v56, %v542_v61 }
 0x134   : > { %v582_v7 = vmul.f32 0.70710677, %v2505_v58  ;;  %v513_v13 = vpop.f32.mrb[27].mxu0  ;;  %v641_v52 = vadd.f32 1.0, %v1926_v2  ;;  %v512_v59 = vadd.f32 %v511_v12, %v2419_v20  ;;  %v671_v22 = vmul.f32 %v639_v63, %v543_v3 }
 0x135   : > { %v583_v9 = vmul.f32 0.70710677, %v2509_v0  ;;  %v672_v4 = vmul.f32 %v640_v6, %v544_v5  ;;  %v514_v18 = vadd.f32 %v513_v13, %v2423_v21  ;;  %v550_v61 = vmul.f32 0.5, %v2505_v58 }
 0x136   : > { %1935 = verf.f32 %v582_v7  ;;  %v673_v23 = vmul.f32 %v641_v52, %v545_v8  ;;  %v584_v1 = vmul.f32 0.70710677, %v512_v59  ;;  %v552_v63 = vmul.f32 0.5, %v512_v59 }
 0x137   : > { %1937 = verf.f32 %v583_v9  ;;  %v585_v24 = vmul.f32 0.70710677, %v514_v18  ;;  %v694_v25 = vpack.c.bf16 %v672_v4, %v670_v15  ;;  %v551_v12 = vmul.f32 0.5, %v2509_v0 }
 0x138   : > { %v1928_v62 = vpop.eup %1927  ;;  %1939 = verf.f32 %v584_v1  ;;  %v695_v27 = vpack.c.bf16 %v673_v23, %v671_v22  ;;  %v553_v2 = vmul.f32 0.5, %v514_v18 }
 0x139   : > { %v1930_v26 = vpop.eup %1929  ;;  %v517_v57 = vpop.f32.mrb[28].mxu0  ;;  %v642_v14 = vadd.f32 1.0, %v1928_v62  ;;  %1941 = verf.f32 %v585_v24 }
 0x13a   : > { %v518_v30 = vadd.f32 %v517_v57, %v2419_v20  ;;  %v519_v31 = vpop.f32.mrb[29].mxu0  ;;  %v1932_v32 = vpop.eup %1931  ;;  %v643_v38 = vadd.f32 1.0, %v1930_v26  ;;  %978 = vmatprep.mubr.bf16.mxu1 %v695_v27 }
 0x13b   : > { %v520_v39 = vadd.f32 %v519_v31, %v2423_v21  ;;  %v521_v41 = vpop.f32.mrb[30].mxu0  ;;  %v1934_v42 = vpop.eup %1933  ;;  %v644_v46 = vadd.f32 1.0, %v1932_v32  ;;  %979 = vmatmul.mubr.bf16.gmra.mrb[16].mxu1 %v694_v25  ;;  %v674_v49 = vmul.f32 %v642_v14, %v546_v36  ;;  %v1877_v32 = vld [vmem:[%s2754_s5 + $0x58] sm:$0xff]   ;;  %v1879_v36 = vld [vmem:[%s2754_s5 + $0x60] sm:$0xff]  }
 0x13c   : > { %v586_v47 = vmul.f32 0.70710677, %v518_v30  ;;  %v523_v28 = vpop.f32.mrb[31].mxu0  ;;  %v645_v43 = vadd.f32 1.0, %v1934_v42  ;;  %v522_v29 = vadd.f32 %v521_v41, %v2419_v20  ;;  %v675_v37 = vmul.f32 %v643_v38, %v547_v44  ;;  %1683 = vmatprep.subr.bf16.mxu0 %v1877_v32  ;;  %1744 = vmatprep.subr.bf16.mxu1 %v1877_v32  ;;  %v1880_v38 = vld [vmem:[%s2754_s5 + $0x20] sm:$0xff]   ;;  %v1882_v41 = vld [vmem:[%s2754_s5 + $0x28] sm:$0xff]  }
 0x13d   : > { %v587_v35 = vmul.f32 0.70710677, %v520_v39  ;;  %v676_v50 = vmul.f32 %v644_v46, %v548_v45  ;;  %v524_v51 = vadd.f32 %v523_v28, %v2423_v21  ;;  %v554_v59 = vmul.f32 0.5, %v518_v30  ;;  %v1878_v30 = vld [vmem:[%s2754_s5 + $0x18] sm:$0xff]   ;;  %v1883_v42 = vld [vmem:[%s2754_s5 + $0x70] sm:$0xff]  }
 0x13e   : > { %1943 = verf.f32 %v586_v47  ;;  %v677_v53 = vmul.f32 %v645_v43, %v549_v48  ;;  %v588_v33 = vmul.f32 0.70710677, %v522_v29  ;;  %v556_v1 = vmul.f32 0.5, %v522_v29  ;;  %1684 = vmatpush3.bf16.msra.mxu0 %v1878_v30  ;;  %1752 = vmatpush3.bf16.msra.mxu1 %v1878_v30  ;;  %v1884_v44 = vld [vmem:[%s2754_s5 + $0x30] sm:$0xff]   ;;  %v1885_v45 = vld [vmem:[%s2754_s5 + $0x78] sm:$0xff]  }
 0x13f   : > { %1945 = verf.f32 %v587_v35  ;;  %v589_v54 = vmul.f32 0.70710677, %v524_v51  ;;  %v696_v55 = vpack.c.bf16 %v676_v50, %v674_v49  ;;  %v555_v0 = vmul.f32 0.5, %v520_v39  ;;  %1685 = vmatprep.subr.bf16.mxu0 %v1879_v36  ;;  %1745 = vmatprep.subr.bf16.mxu1 %v1879_v36  ;;  %v1881_v39 = vld [vmem:[%s2754_s5 + $0x68] sm:$0xff]   ;;  %v1886_v46 = vld [vmem:[%s2754_s5 + $0x38] sm:$0xff]  }
 0x140   : > { %v1936_v40 = vpop.eup %1935  ;;  %1947 = verf.f32 %v588_v33  ;;  %v697_v56 = vpack.c.bf16 %v677_v53, %v675_v37  ;;  %v557_v18 = vmul.f32 0.5, %v524_v51  ;;  %v734_v47 = vld [vmem:[%s2753_s4] sm:$0x3] }
 0x141   : > { %v1938_v10 = vpop.eup %1937  ;;  %v646_v34 = vadd.f32 1.0, %v1936_v40  ;;  %1949 = verf.f32 %v589_v54  ;;  %v2561_v28 = vrot.slane %v734_v47, %v325_v17  ;;  %v2565_v48 = vrot.slane %v734_v47, %v329_v19 }
 0x142   : > { %v1940_v11 = vpop.eup %1939  ;;  %v647_v60 = vadd.f32 1.0, %v1938_v10  ;;  %988 = vmatprep.mubr.bf16.mxu1 %v697_v56  ;;  %1686 = vmatpush3.bf16.msra.mxu0 %v1880_v38 }
 0x143   : > { %v1942_v20 = vpop.eup %1941  ;;  %v648_v21 = vadd.f32 1.0, %v1940_v11  ;;  %989 = vmatmul.mubr.bf16.gmra.mrb[20].mxu1 %v696_v55  ;;  %v678_v5 = vmul.f32 %v646_v34, %v550_v61  ;;  %1687 = vmatprep.subr.bf16.mxu0 %v1881_v39 }
 0x144   : > { %v649_v3 = vadd.f32 1.0, %v1942_v20  ;;  %v679_v7 = vmul.f32 %v647_v60, %v551_v12  ;;  %1753 = vmatpush3.bf16.msra.mxu1 %v1880_v38 }
 0x145   : > { %v680_v6 = vmul.f32 %v648_v21, %v552_v63  ;;  %1746 = vmatprep.subr.bf16.mxu1 %v1881_v39 }
 0x146   : > { %v681_v13 = vmul.f32 %v649_v3, %v553_v2  ;;  %1688 = vmatpush3.bf16.msra.mxu0 %v1882_v41 }
 0x147   : > { %v698_v52 = vpack.c.bf16 %v680_v6, %v678_v5  ;;  %1689 = vmatprep.subr.bf16.mxu0 %v1883_v42 }
 0x148   : > { %v1944_v8 = vpop.eup %1943  ;;  %v699_v15 = vpack.c.bf16 %v681_v13, %v679_v7  ;;  %1754 = vmatpush3.bf16.msra.mxu1 %v1882_v41 }
 0x149   : > { %v1946_v9 = vpop.eup %1945  ;;  %v650_v4 = vadd.f32 1.0, %v1944_v8  ;;  %1747 = vmatprep.subr.bf16.mxu1 %v1883_v42 }
 0x14a   : > { %v1948_v22 = vpop.eup %1947  ;;  %v651_v23 = vadd.f32 1.0, %v1946_v9  ;;  %998 = vmatprep.mubr.bf16.mxu1 %v699_v15  ;;  %1690 = vmatpush3.bf16.msra.mxu0 %v1884_v44 }
 0x14b   : > { %v1950_v58 = vpop.eup %1949  ;;  %v652_v62 = vadd.f32 1.0, %v1948_v22  ;;  %999 = vmatmul.mubr.bf16.gmra.mrb[24].mxu1 %v698_v52  ;;  %v682_v25 = vmul.f32 %v650_v4, %v554_v59  ;;  %1691 = vmatprep.subr.bf16.mxu0 %v1885_v45 }
 0x14c   : > { %v653_v24 = vadd.f32 1.0, %v1950_v58  ;;  %v683_v57 = vmul.f32 %v651_v23, %v555_v0  ;;  %1755 = vmatpush3.bf16.msra.mxu1 %v1884_v44 }
 0x14d   : > { %v684_v26 = vmul.f32 %v652_v62, %v556_v1  ;;  %1748 = vmatprep.subr.bf16.mxu1 %v1885_v45 }
 0x14e   : > { %v685_v27 = vmul.f32 %v653_v24, %v557_v18  ;;  %1692 = vmatpush3.bf16.msra.mxu0 %v1886_v46 }
 0x14f   : > { %v700_v14 = vpack.c.bf16 %v684_v26, %v682_v25 }
 0x150   : > { %v701_v31 = vpack.c.bf16 %v685_v27, %v683_v57  ;;  %1756 = vmatpush3.bf16.msra.mxu1 %v1886_v46 }
 0x152   : > { %1008 = vmatprep.mubr.bf16.mxu1 %v701_v31 }
 0x153   : > { %1009 = vmatmul.mubr.bf16.gmra.mrb[28].mxu1 %v700_v14 }
 0x1ee   : > { %v940_v43 = vpop.f32.mrb[0].mxu1 }
 0x1ef   : > { %v941_v35 = vadd.f32 %v940_v43, %v2561_v28  ;;  %v942_v29 = vpop.f32.mrb[1].mxu1 }
 0x1f0   : > { %v943_v49 = vadd.f32 %v942_v29, %v2565_v48  ;;  %v944_v50 = vpop.f32.mrb[2].mxu1 }
 0x1f1   : > { %v1051_v51 = vmul.f32 0.70710677, %v941_v35  ;;  %v945_v37 = vadd.f32 %v944_v50, %v2561_v28  ;;  %v946_v53 = vpop.f32.mrb[3].mxu1  ;;  %v1019_v9 = vmul.f32 0.5, %v941_v35 }
 0x1f2   : > { %v1052_v33 = vmul.f32 0.70710677, %v943_v49  ;;  %v947_v40 = vadd.f32 %v946_v53, %v2565_v48  ;;  %v1020_v58 = vmul.f32 0.5, %v943_v49 }
 0x1f3   : > { %1951 = verf.f32 %v1051_v51  ;;  %v1053_v17 = vmul.f32 0.70710677, %v945_v37  ;;  %v1021_v15 = vmul.f32 0.5, %v945_v37 }
 0x1f4   : > { %1953 = verf.f32 %v1052_v33  ;;  %v1054_v16 = vmul.f32 0.70710677, %v947_v40  ;;  %v1022_v59 = vmul.f32 0.5, %v947_v40 }
 0x1f5   : > { %1955 = verf.f32 %v1053_v17 }
 0x1f6   : > { %1957 = verf.f32 %v1054_v16  ;;  %v950_v19 = vpop.f32.mrb[4].mxu1 }
 0x1f7   : > { %v951_v54 = vadd.f32 %v950_v19, %v2561_v28  ;;  %v952_v55 = vpop.f32.mrb[5].mxu1 }
 0x1f8   : > { %v953_v10 = vadd.f32 %v952_v55, %v2565_v48  ;;  %v954_v56 = vpop.f32.mrb[6].mxu1 }
 0x1f9   : > { %v1055_v34 = vmul.f32 0.70710677, %v951_v54  ;;  %v955_v11 = vadd.f32 %v954_v56, %v2561_v28  ;;  %v956_v60 = vpop.f32.mrb[7].mxu1  ;;  %v1023_v35 = vmul.f32 0.5, %v951_v54 }
 0x1fa   : > { %v1056_v20 = vmul.f32 0.70710677, %v953_v10  ;;  %v957_v61 = vadd.f32 %v956_v60, %v2565_v48  ;;  %v1024_v37 = vmul.f32 0.5, %v953_v10 }
 0x1fb   : > { %1959 = verf.f32 %v1055_v34  ;;  %v1057_v63 = vmul.f32 0.70710677, %v955_v11  ;;  %v1025_v29 = vmul.f32 0.5, %v955_v11 }
 0x1fc   : > { %1961 = verf.f32 %v1056_v20  ;;  %v1058_v21 = vmul.f32 0.70710677, %v957_v61  ;;  %v1026_v53 = vmul.f32 0.5, %v957_v61 }
 0x1fd   : > { %v1952_v12 = vpop.eup %1951  ;;  %1963 = verf.f32 %v1057_v63 }
 0x1fe   : > { %v1954_v2 = vpop.eup %1953  ;;  %v1115_v3 = vadd.f32 1.0, %v1952_v12  ;;  %1965 = verf.f32 %v1058_v21  ;;  %v960_v5 = vpop.f32.mrb[8].mxu1 }
 0x1ff   : > { %v1956_v6 = vpop.eup %1955  ;;  %v1116_v7 = vadd.f32 1.0, %v1954_v2  ;;  %v2576_v13 = vadd.f32 %v960_v5, %v2561_v28  ;;  %v962_v8 = vpop.f32.mrb[9].mxu1 }
 0x200   : > { %v1958_v52 = vpop.eup %1957  ;;  %v1117_v4 = vadd.f32 1.0, %v1956_v6  ;;  %v2579_v22 = vadd.f32 %v962_v8, %v2565_v48  ;;  %v964_v23 = vpop.f32.mrb[10].mxu1  ;;  %v1147_v18 = vmul.f32 %v1115_v3, %v1019_v9 }
 0x201   : > { %v1118_v1 = vadd.f32 1.0, %v1958_v52  ;;  %v1059_v62 = vmul.f32 0.70710677, %v2576_v13  ;;  %v966_v0 = vpop.f32.mrb[11].mxu1  ;;  %v965_v26 = vadd.f32 %v964_v23, %v2561_v28  ;;  %v1148_v57 = vmul.f32 %v1116_v7, %v1020_v58 }
 0x202   : > { %v1149_v24 = vmul.f32 %v1117_v4, %v1021_v15  ;;  %v1060_v25 = vmul.f32 0.70710677, %v2579_v22  ;;  %v967_v14 = vadd.f32 %v966_v0, %v2565_v48  ;;  %v1027_v7 = vmul.f32 0.5, %v2576_v13 }
 0x203   : > { %v1150_v27 = vmul.f32 %v1118_v1, %v1022_v59  ;;  %1967 = verf.f32 %v1059_v62  ;;  %v1061_v32 = vmul.f32 0.70710677, %v965_v26  ;;  %v1028_v4 = vmul.f32 0.5, %v2579_v22 }
 0x204   : > { %v1179_v31 = vpack.c.bf16 %v1149_v24, %v1147_v18  ;;  %1969 = verf.f32 %v1060_v25  ;;  %v1062_v36 = vmul.f32 0.70710677, %v967_v14  ;;  %v1029_v23 = vmul.f32 0.5, %v965_v26 }
 0x205   : > { %v1960_v30 = vpop.eup %1959  ;;  %v1180_v38 = vpack.c.bf16 %v1150_v27, %v1148_v57  ;;  %1971 = verf.f32 %v1061_v32  ;;  %v1030_v62 = vmul.f32 0.5, %v967_v14 }
 0x206   : > { %v1962_v39 = vpop.eup %1961  ;;  %v1119_v41 = vadd.f32 1.0, %v1960_v30  ;;  %v970_v42 = vpop.f32.mrb[12].mxu1  ;;  %1973 = verf.f32 %v1062_v36 }
 0x207   : > { %v1964_v44 = vpop.eup %1963  ;;  %v1120_v45 = vadd.f32 1.0, %v1962_v39  ;;  %v2586_v46 = vadd.f32 %v970_v42, %v2561_v28  ;;  %v972_v47 = vpop.f32.mrb[13].mxu1  ;;  %1362 = vmatprep.mubr.bf16.mxu0 %v1180_v38 }
 0x208   : > { %v1966_v43 = vpop.eup %1965  ;;  %v1121_v49 = vadd.f32 1.0, %v1964_v44  ;;  %v2589_v50 = vadd.f32 %v972_v47, %v2565_v48  ;;  %v974_v51 = vpop.f32.mrb[14].mxu1  ;;  %1363 = vmatmul.mubr.bf16.vlgmr.msra.gmra.mrb[32].mxu0 %v1179_v31  ;;  %v1151_v16 = vmul.f32 %v1119_v41, %v1023_v35 }
 0x209   : > { %v1122_v33 = vadd.f32 1.0, %v1966_v43  ;;  %v1063_v40 = vmul.f32 0.70710677, %v2586_v46  ;;  %v976_v17 = vpop.f32.mrb[15].mxu1  ;;  %v975_v56 = vadd.f32 %v974_v51, %v2561_v28  ;;  %v1152_v54 = vmul.f32 %v1120_v45, %v1024_v37 }
 0x20a   : > { %v1153_v19 = vmul.f32 %v1121_v49, %v1025_v29  ;;  %v1064_v55 = vmul.f32 0.70710677, %v2589_v50  ;;  %v977_v11 = vadd.f32 %v976_v17, %v2565_v48  ;;  %v1031_v45 = vmul.f32 0.5, %v2586_v46 }
 0x20b   : > { %v1154_v34 = vmul.f32 %v1122_v33, %v1026_v53  ;;  %1975 = verf.f32 %v1063_v40  ;;  %v1065_v60 = vmul.f32 0.70710677, %v975_v56  ;;  %v1032_v49 = vmul.f32 0.5, %v2589_v50 }
 0x20c   : > { %1977 = verf.f32 %v1064_v55  ;;  %v1181_v20 = vpack.c.bf16 %v1153_v19, %v1151_v16  ;;  %v1066_v61 = vmul.f32 0.70710677, %v977_v11  ;;  %v1033_v51 = vmul.f32 0.5, %v975_v56 }
 0x20d   : > { %v1968_v10 = vpop.eup %1967  ;;  %v1182_v63 = vpack.c.bf16 %v1154_v34, %v1152_v54  ;;  %1979 = verf.f32 %v1065_v60  ;;  %v1034_v40 = vmul.f32 0.5, %v977_v11 }
 0x20e   : > { %v1970_v21 = vpop.eup %1969  ;;  %v980_v12 = vpop.f32.mrb[16].mxu1  ;;  %v1123_v2 = vadd.f32 1.0, %v1968_v10  ;;  %1981 = verf.f32 %v1066_v61 }
 0x20f   : > { %v2596_v3 = vadd.f32 %v980_v12, %v2561_v28  ;;  %v982_v5 = vpop.f32.mrb[17].mxu1  ;;  %1370 = vmatprep.mubr.bf16.mxu0 %v1182_v63  ;;  %v1972_v6 = vpop.eup %1971  ;;  %v1124_v8 = vadd.f32 1.0, %v1970_v21 }
 0x210   : > { %v2600_v52 = vadd.f32 %v982_v5, %v2565_v48  ;;  %v984_v9 = vpop.f32.mrb[18].mxu1  ;;  %1371 = vmatmul.mubr.bf16.gmra.mrb[36].mxu0 %v1181_v20  ;;  %v1974_v15 = vpop.eup %1973  ;;  %v1125_v58 = vadd.f32 1.0, %v1972_v6  ;;  %v1155_v24 = vmul.f32 %v1123_v2, %v1027_v7 }
 0x211   : > { %v1067_v59 = vmul.f32 0.70710677, %v2596_v3  ;;  %v986_v1 = vpop.f32.mrb[19].mxu1  ;;  %v1126_v0 = vadd.f32 1.0, %v1974_v15  ;;  %v2606_v13 = vadd.f32 %v984_v9, %v2561_v28  ;;  %v1156_v27 = vmul.f32 %v1124_v8, %v1028_v4 }
 0x212   : > { %v1068_v18 = vmul.f32 0.70710677, %v2600_v52  ;;  %v1157_v25 = vmul.f32 %v1125_v58, %v1029_v23  ;;  %v2609_v57 = vadd.f32 %v986_v1, %v2565_v48  ;;  %v1035_v6 = vmul.f32 0.5, %v2596_v3 }
 0x213   : > { %1983 = verf.f32 %v1067_v59  ;;  %v1158_v22 = vmul.f32 %v1126_v0, %v1030_v62  ;;  %v1069_v26 = vmul.f32 0.70710677, %v2606_v13  ;;  %v1036_v4 = vmul.f32 0.5, %v2600_v52 }
 0x214   : > { %1985 = verf.f32 %v1068_v18  ;;  %v1070_v14 = vmul.f32 0.70710677, %v2609_v57  ;;  %v1183_v32 = vpack.c.bf16 %v1157_v25, %v1155_v24  ;;  %v1037_v23 = vmul.f32 0.5, %v2606_v13 }
 0x215   : > { %v1976_v31 = vpop.eup %1975  ;;  %1987 = verf.f32 %v1069_v26  ;;  %v1184_v38 = vpack.c.bf16 %v1158_v22, %v1156_v27  ;;  %v1038_v62 = vmul.f32 0.5, %v2609_v57 }
 0x216   : > { %v1978_v30 = vpop.eup %1977  ;;  %v990_v36 = vpop.f32.mrb[20].mxu1  ;;  %v1127_v39 = vadd.f32 1.0, %v1976_v31  ;;  %1989 = verf.f32 %v1070_v14 }
 0x217   : > { %v2614_v41 = vadd.f32 %v990_v36, %v2561_v28  ;;  %v992_v42 = vpop.f32.mrb[21].mxu1  ;;  %v1980_v44 = vpop.eup %1979  ;;  %v1128_v47 = vadd.f32 1.0, %v1978_v30  ;;  %1378 = vmatprep.mubr.bf16.mxu0 %v1184_v38 }
 0x218   : > { %v2618_v43 = vadd.f32 %v992_v42, %v2565_v48  ;;  %v994_v35 = vpop.f32.mrb[22].mxu1  ;;  %v1982_v29 = vpop.eup %1981  ;;  %v1129_v37 = vadd.f32 1.0, %v1980_v44  ;;  %1379 = vmatmul.mubr.bf16.gmra.mrb[40].mxu0 %v1183_v32  ;;  %v1159_v19 = vmul.f32 %v1127_v39, %v1031_v45 }
 0x219   : > { %v1071_v53 = vmul.f32 0.70710677, %v2614_v41  ;;  %v996_v33 = vpop.f32.mrb[23].mxu1  ;;  %v1130_v17 = vadd.f32 1.0, %v1982_v29  ;;  %v2624_v46 = vadd.f32 %v994_v35, %v2561_v28  ;;  %v1160_v50 = vmul.f32 %v1128_v47, %v1032_v49 }
 0x21a   : > { %v1072_v16 = vmul.f32 0.70710677, %v2618_v43  ;;  %v1161_v55 = vmul.f32 %v1129_v37, %v1033_v51  ;;  %v2627_v54 = vadd.f32 %v996_v33, %v2565_v48  ;;  %v1039_v44 = vmul.f32 0.5, %v2614_v41 }
 0x21b   : > { %1991 = verf.f32 %v1071_v53  ;;  %v1162_v56 = vmul.f32 %v1130_v17, %v1034_v40  ;;  %v1073_v34 = vmul.f32 0.70710677, %v2624_v46  ;;  %v1040_v49 = vmul.f32 0.5, %v2618_v43 }
 0x21c   : > { %1993 = verf.f32 %v1072_v16  ;;  %v1074_v11 = vmul.f32 0.70710677, %v2627_v54  ;;  %v1185_v20 = vpack.c.bf16 %v1161_v55, %v1159_v19  ;;  %v1041_v51 = vmul.f32 0.5, %v2624_v46 }
 0x21d   : > { %v1984_v60 = vpop.eup %1983  ;;  %1995 = verf.f32 %v1073_v34  ;;  %v1186_v63 = vpack.c.bf16 %v1162_v56, %v1160_v50  ;;  %v1042_v40 = vmul.f32 0.5, %v2627_v54 }
 0x21e   : > { %v1986_v10 = vpop.eup %1985  ;;  %v1000_v61 = vpop.f32.mrb[24].mxu1  ;;  %v1131_v21 = vadd.f32 1.0, %v1984_v60  ;;  %1997 = verf.f32 %v1074_v11 }
 0x21f   : > { %v2632_v12 = vadd.f32 %v1000_v61, %v2561_v28  ;;  %v1002_v2 = vpop.f32.mrb[25].mxu1  ;;  %v1988_v5 = vpop.eup %1987  ;;  %v1132_v7 = vadd.f32 1.0, %v1986_v10  ;;  %1386 = vmatprep.mubr.bf16.mxu0 %v1186_v63 }
 0x220   : > { %v2636_v8 = vadd.f32 %v1002_v2, %v2565_v48  ;;  %v1004_v9 = vpop.f32.mrb[26].mxu1  ;;  %v1990_v15 = vpop.eup %1989  ;;  %v1133_v58 = vadd.f32 1.0, %v1988_v5  ;;  %1387 = vmatmul.mubr.bf16.gmra.mrb[44].mxu0 %v1185_v20  ;;  %v1163_v24 = vmul.f32 %v1131_v21, %v1035_v6 }
 0x221   : > { %v1075_v59 = vmul.f32 0.70710677, %v2632_v12  ;;  %v1006_v1 = vpop.f32.mrb[27].mxu1  ;;  %v1134_v0 = vadd.f32 1.0, %v1990_v15  ;;  %v1005_v18 = vadd.f32 %v1004_v9, %v2561_v28  ;;  %v1164_v52 = vmul.f32 %v1132_v7, %v1036_v4 }
 0x222   : > { %v1076_v3 = vmul.f32 0.70710677, %v2636_v8  ;;  %v1165_v25 = vmul.f32 %v1133_v58, %v1037_v23  ;;  %v1007_v27 = vadd.f32 %v1006_v1, %v2565_v48  ;;  %v1043_v21 = vmul.f32 0.5, %v2632_v12 }
 0x223   : > { %1999 = verf.f32 %v1075_v59  ;;  %v1166_v22 = vmul.f32 %v1134_v0, %v1038_v62  ;;  %v1077_v13 = vmul.f32 0.70710677, %v1005_v18  ;;  %v1045_v2 = vmul.f32 0.5, %v1005_v18 }
 0x224   : > { %2001 = verf.f32 %v1076_v3  ;;  %v1078_v31 = vmul.f32 0.70710677, %v1007_v27  ;;  %v1187_v14 = vpack.c.bf16 %v1165_v25, %v1163_v24  ;;  %v1044_v5 = vmul.f32 0.5, %v2636_v8 }
 0x225   : > { %v1992_v26 = vpop.eup %1991  ;;  %2003 = verf.f32 %v1077_v13  ;;  %v1188_v30 = vpack.c.bf16 %v1166_v22, %v1164_v52  ;;  %v1046_v6 = vmul.f32 0.5, %v1007_v27 }
 0x226   : > { %v1994_v32 = vpop.eup %1993  ;;  %v1010_v57 = vpop.f32.mrb[28].mxu1  ;;  %v1135_v36 = vadd.f32 1.0, %v1992_v26  ;;  %2005 = verf.f32 %v1078_v31 }
 0x227   : > { %v1011_v38 = vadd.f32 %v1010_v57, %v2561_v28  ;;  %v1012_v39 = vpop.f32.mrb[29].mxu1  ;;  %v1996_v42 = vpop.eup %1995  ;;  %v1136_v45 = vadd.f32 1.0, %v1994_v32  ;;  %1394 = vmatprep.mubr.bf16.mxu0 %v1188_v30 }
 0x228   : > { %v1013_v47 = vadd.f32 %v1012_v39, %v2565_v48  ;;  %v1014_v35 = vpop.f32.mrb[30].mxu1  ;;  %v1998_v29 = vpop.eup %1997  ;;  %v1137_v37 = vadd.f32 1.0, %v1996_v42  ;;  %1395 = vmatmul.mubr.bf16.gmra.mrb[48].mxu0 %v1187_v14  ;;  %v1167_v19 = vmul.f32 %v1135_v36, %v1039_v44  ;;  %v2658_v36 = vld [vmem:[%s2755_s6] ss:$0 sm:$0xff] }
 0x229   : > { %v1079_v53 = vmul.f32 0.70710677, %v1011_v38  ;;  %v1016_v33 = vpop.f32.mrb[31].mxu1  ;;  %v1138_v17 = vadd.f32 1.0, %v1998_v29  ;;  %v1015_v41 = vadd.f32 %v1014_v35, %v2561_v28  ;;  %v1168_v56 = vmul.f32 %v1136_v45, %v1040_v49 }
 0x22a   : > { %v1080_v16 = vmul.f32 0.70710677, %v1013_v47  ;;  %v1169_v55 = vmul.f32 %v1137_v37, %v1041_v51  ;;  %v1017_v50 = vadd.f32 %v1016_v33, %v2565_v48  ;;  %v1047_v18 = vmul.f32 0.5, %v1011_v38 }
 0x22b   : > { %2007 = verf.f32 %v1079_v53  ;;  %v1170_v34 = vmul.f32 %v1138_v17, %v1042_v40  ;;  %v1081_v43 = vmul.f32 0.70710677, %v1015_v41  ;;  %v1049_v25 = vmul.f32 0.5, %v1015_v41 }
 0x22c   : > { %2009 = verf.f32 %v1080_v16  ;;  %v1082_v60 = vmul.f32 0.70710677, %v1017_v50  ;;  %v1189_v11 = vpack.c.bf16 %v1169_v55, %v1167_v19  ;;  %v1048_v8 = vmul.f32 0.5, %v1013_v47 }
 0x22d   : > { %v2000_v46 = vpop.eup %1999  ;;  %2011 = verf.f32 %v1081_v43  ;;  %v1190_v10 = vpack.c.bf16 %v1170_v34, %v1168_v56  ;;  %v1050_v27 = vmul.f32 0.5, %v1017_v50 }
 0x22e   : > { %v2002_v20 = vpop.eup %2001  ;;  %v1139_v54 = vadd.f32 1.0, %v2000_v46  ;;  %2013 = verf.f32 %v1082_v60 }
 0x22f   : > { %v2004_v61 = vpop.eup %2003  ;;  %v1140_v63 = vadd.f32 1.0, %v2002_v20  ;;  %1402 = vmatprep.mubr.bf16.mxu0 %v1190_v10 }
 0x230   : > { %v2006_v28 = vpop.eup %2005  ;;  %v1141_v48 = vadd.f32 1.0, %v2004_v61  ;;  %1403 = vmatmul.mubr.bf16.gmra.mrb[52].mxu0 %v1189_v11  ;;  %v1171_v9 = vmul.f32 %v1139_v54, %v1043_v21 }
 0x231   : > { %v1142_v7 = vadd.f32 1.0, %v2006_v28  ;;  %v1172_v4 = vmul.f32 %v1140_v63, %v1044_v5 }
 0x232   : > { %v1173_v15 = vmul.f32 %v1141_v48, %v1045_v2 }
 0x233   : > { %v1174_v23 = vmul.f32 %v1142_v7, %v1046_v6 }
 0x234   : > { %v1191_v59 = vpack.c.bf16 %v1173_v15, %v1171_v9 }
 0x235   : > { %v2008_v58 = vpop.eup %2007  ;;  %v1192_v62 = vpack.c.bf16 %v1174_v23, %v1172_v4 }
 0x236   : > { %v2010_v1 = vpop.eup %2009  ;;  %v1143_v0 = vadd.f32 1.0, %v2008_v58 }
 0x237   : > { %v2012_v3 = vpop.eup %2011  ;;  %v1144_v24 = vadd.f32 1.0, %v2010_v1  ;;  %1410 = vmatprep.mubr.bf16.mxu1 %v1192_v62 }
 0x238   : > { %v2014_v12 = vpop.eup %2013  ;;  %v1145_v52 = vadd.f32 1.0, %v2012_v3  ;;  %1411 = vmatmul.mubr.bf16.vlgmr.msra.gmra.mrb[32].mxu1 %v1191_v59  ;;  %v1175_v13 = vmul.f32 %v1143_v0, %v1047_v18 }
 0x239   : > { %v1146_v22 = vadd.f32 1.0, %v2014_v12  ;;  %v1176_v31 = vmul.f32 %v1144_v24, %v1048_v8 }
 0x23a   : > { %v1177_v26 = vmul.f32 %v1145_v52, %v1049_v25 }
 0x23b   : > { %v1178_v14 = vmul.f32 %v1146_v22, %v1050_v27 }
 0x23c   : > { %v1193_v32 = vpack.c.bf16 %v1177_v26, %v1175_v13 }
 0x23d   : > { %v1194_v57 = vpack.c.bf16 %v1178_v14, %v1176_v31 }
 0x23f   : > { %1418 = vmatprep.mubr.bf16.mxu1 %v1194_v57 }
 0x240   : > { %1419 = vmatmul.mubr.bf16.gmra.mrb[36].mxu1 %v1193_v32 }
 0x2db   : > { %v1693_v30 = vpop.f32.mrb[32].mxu0 }
 0x2dc   : > { %v1694_v38 = vpop.f32.mrb[33].mxu0 }
 0x2dd   : > { %v1695_v39 = vadd.f32 %v1694_v38, %v1693_v30  ;;  %v1696_v42 = vpop.f32.mrb[34].mxu0 }
 0x2de   : > { %v1697_v44 = vpop.f32.mrb[35].mxu0 }
 0x2df   : > { %v1365_v45 = vadd.f32 %v1695_v39, %v2658_v36  ;;  %v1698_v47 = vadd.f32 %v1697_v44, %v1696_v42 }
 0x2e1   : > { %v1443_v35 = vmul.f32 0.70710677, %v1365_v45  ;;  %v1368_v29 = vadd.f32 %v1698_v47, %v2658_v36  ;;  %v1427_v43 = vmul.f32 0.5, %v1365_v45 }
 0x2e3   : > { %2015 = verf.f32 %v1443_v35  ;;  %v1444_v49 = vmul.f32 0.70710677, %v1368_v29  ;;  %v1699_v51 = vpop.f32.mrb[36].mxu0  ;;  %v1428_v10 = vmul.f32 0.5, %v1368_v29 }
 0x2e4   : > { %v1700_v37 = vpop.f32.mrb[37].mxu0 }
 0x2e5   : > { %2017 = verf.f32 %v1444_v49  ;;  %v1701_v53 = vadd.f32 %v1700_v37, %v1699_v51  ;;  %v1702_v33 = vpop.f32.mrb[38].mxu0 }
 0x2e6   : > { %v1703_v40 = vpop.f32.mrb[39].mxu0 }
 0x2e7   : > { %v1373_v17 = vadd.f32 %v1701_v53, %v2658_v36  ;;  %v1704_v16 = vadd.f32 %v1703_v40, %v1702_v33 }
 0x2e9   : > { %v1445_v41 = vmul.f32 0.70710677, %v1373_v17  ;;  %v1376_v19 = vadd.f32 %v1704_v16, %v2658_v36  ;;  %v1429_v4 = vmul.f32 0.5, %v1373_v17 }
 0x2eb   : > { %2019 = verf.f32 %v1445_v41  ;;  %v1446_v55 = vmul.f32 0.70710677, %v1376_v19  ;;  %v1705_v50 = vpop.f32.mrb[40].mxu0  ;;  %v1430_v62 = vmul.f32 0.5, %v1376_v19 }
 0x2ec   : > { %v1706_v34 = vpop.f32.mrb[41].mxu0 }
 0x2ed   : > { %v2016_v56 = vpop.eup %2015  ;;  %2021 = verf.f32 %v1446_v55  ;;  %v1707_v60 = vadd.f32 %v1706_v34, %v1705_v50  ;;  %v1708_v11 = vpop.f32.mrb[42].mxu0 }
 0x2ee   : > { %v1475_v46 = vadd.f32 1.0, %v2016_v56  ;;  %v1709_v54 = vpop.f32.mrb[43].mxu0 }
 0x2ef   : > { %v2018_v20 = vpop.eup %2017  ;;  %v1381_v28 = vadd.f32 %v1707_v60, %v2658_v36  ;;  %v1710_v21 = vadd.f32 %v1709_v54, %v1708_v11 }
 0x2f0   : > { %v1491_v61 = vmul.f32 %v1475_v46, %v1427_v43  ;;  %v1476_v63 = vadd.f32 1.0, %v2018_v20 }
 0x2f1   : > { %v1447_v48 = vmul.f32 0.70710677, %v1381_v28  ;;  %v1384_v5 = vadd.f32 %v1710_v21, %v2658_v36  ;;  %v1431_v32 = vmul.f32 0.5, %v1381_v28 }
 0x2f2   : > { %1507 = vst [vmem:[%s2668_s17] sm:$0xff] %v1491_v61  ;;  %v1492_v2 = vmul.f32 %v1476_v63, %v1428_v10 }
 0x2f3   : > { %2023 = verf.f32 %v1447_v48  ;;  %v1448_v6 = vmul.f32 0.70710677, %v1384_v5  ;;  %v1711_v7 = vpop.f32.mrb[44].mxu0  ;;  %v1432_v45 = vmul.f32 0.5, %v1384_v5 }
 0x2f4   : > { %1508 = vst [vmem:[%s2668_s17 + $0x8] sm:$0xff] %v1492_v2  ;;  %v1712_v15 = vpop.f32.mrb[45].mxu0 }
 0x2f5   : > { %v2020_v9 = vpop.eup %2019  ;;  %2025 = verf.f32 %v1448_v6  ;;  %v1713_v58 = vadd.f32 %v1712_v15, %v1711_v7  ;;  %v1714_v59 = vpop.f32.mrb[46].mxu0 }
 0x2f6   : > { %v1477_v23 = vadd.f32 1.0, %v2020_v9  ;;  %v1715_v0 = vpop.f32.mrb[47].mxu0 }
 0x2f7   : > { %v2022_v1 = vpop.eup %2021  ;;  %v1389_v12 = vadd.f32 %v1713_v58, %v2658_v36  ;;  %v1716_v18 = vadd.f32 %v1715_v0, %v1714_v59 }
 0x2f8   : > { %v1493_v3 = vmul.f32 %v1477_v23, %v1429_v4  ;;  %v1478_v24 = vadd.f32 1.0, %v2022_v1 }
 0x2f9   : > { %v1449_v52 = vmul.f32 0.70710677, %v1389_v12  ;;  %v1392_v8 = vadd.f32 %v1716_v18, %v2658_v36  ;;  %v1433_v16 = vmul.f32 0.5, %v1389_v12 }
 0x2fa   : > { %1509 = vst [vmem:[%s2668_s17 + $0x10] sm:$0xff] %v1493_v3  ;;  %v1494_v25 = vmul.f32 %v1478_v24, %v1430_v62 }
 0x2fb   : > { %2027 = verf.f32 %v1449_v52  ;;  %v1450_v27 = vmul.f32 0.70710677, %v1392_v8  ;;  %v1717_v22 = vpop.f32.mrb[48].mxu0  ;;  %v1434_v43 = vmul.f32 0.5, %v1392_v8 }
 0x2fc   : > { %1510 = vst [vmem:[%s2668_s17 + $0x18] sm:$0xff] %v1494_v25  ;;  %v1718_v13 = vpop.f32.mrb[49].mxu0 }
 0x2fd   : > { %v2024_v26 = vpop.eup %2023  ;;  %2029 = verf.f32 %v1450_v27  ;;  %v1719_v31 = vadd.f32 %v1718_v13, %v1717_v22  ;;  %v1720_v14 = vpop.f32.mrb[50].mxu0 }
 0x2fe   : > { %v1479_v57 = vadd.f32 1.0, %v2024_v26  ;;  %v1721_v30 = vpop.f32.mrb[51].mxu0 }
 0x2ff   : > { %v2026_v38 = vpop.eup %2025  ;;  %v1397_v39 = vadd.f32 %v1719_v31, %v2658_v36  ;;  %v1722_v42 = vadd.f32 %v1721_v30, %v1720_v14 }
 0x300   : > { %v1495_v44 = vmul.f32 %v1479_v57, %v1431_v32  ;;  %v1480_v47 = vadd.f32 1.0, %v2026_v38 }
 0x301   : > { %v1451_v35 = vmul.f32 0.70710677, %v1397_v39  ;;  %v1400_v29 = vadd.f32 %v1722_v42, %v2658_v36  ;;  %v1435_v2 = vmul.f32 0.5, %v1397_v39 }
 0x302   : > { %1511 = vst [vmem:[%s2668_s17 + $0x20] sm:$0xff] %v1495_v44  ;;  %v1496_v49 = vmul.f32 %v1480_v47, %v1432_v45 }
 0x303   : > { %2031 = verf.f32 %v1451_v35  ;;  %v1452_v51 = vmul.f32 0.70710677, %v1400_v29  ;;  %v1723_v37 = vpop.f32.mrb[52].mxu0  ;;  %v1436_v4 = vmul.f32 0.5, %v1400_v29 }
 0x304   : > { %1512 = vst [vmem:[%s2668_s17 + $0x28] sm:$0xff] %v1496_v49  ;;  %v1724_v53 = vpop.f32.mrb[53].mxu0 }
 0x305   : > { %v2028_v33 = vpop.eup %2027  ;;  %2033 = verf.f32 %v1452_v51  ;;  %v1725_v40 = vadd.f32 %v1724_v53, %v1723_v37  ;;  %v1726_v17 = vpop.f32.mrb[54].mxu0 }
 0x306   : > { %v1481_v41 = vadd.f32 1.0, %v2028_v33  ;;  %v1727_v19 = vpop.f32.mrb[55].mxu0 }
 0x307   : > { %v2030_v55 = vpop.eup %2029  ;;  %v1405_v50 = vadd.f32 %v1725_v40, %v2658_v36  ;;  %v1728_v56 = vadd.f32 %v1727_v19, %v1726_v17 }
 0x308   : > { %v1497_v34 = vmul.f32 %v1481_v41, %v1433_v16  ;;  %v1482_v46 = vadd.f32 1.0, %v2030_v55 }
 0x309   : > { %v1453_v60 = vmul.f32 0.70710677, %v1405_v50  ;;  %v1408_v11 = vadd.f32 %v1728_v56, %v2658_v36  ;;  %v1437_v25 = vmul.f32 0.5, %v1405_v50 }
 0x30a   : > { %1513 = vst [vmem:[%s2668_s17 + $0x30] sm:$0xff] %v1497_v34  ;;  %v1498_v20 = vmul.f32 %v1482_v46, %v1434_v43 }
 0x30b   : > { %2035 = verf.f32 %v1453_v60  ;;  %v1454_v10 = vmul.f32 0.70710677, %v1408_v11  ;;  %v1729_v54 = vpop.f32.mrb[32].mxu1  ;;  %v1438_v31 = vmul.f32 0.5, %v1408_v11 }
 0x30c   : > { %1514 = vst [vmem:[%s2668_s17 + $0x38] sm:$0xff] %v1498_v20  ;;  %v1730_v61 = vpop.f32.mrb[33].mxu1 }
 0x30d   : > { %v2032_v63 = vpop.eup %2031  ;;  %2037 = verf.f32 %v1454_v10  ;;  %v1731_v28 = vadd.f32 %v1730_v61, %v1729_v54  ;;  %v1732_v21 = vpop.f32.mrb[34].mxu1 }
 0x30e   : > { %v1483_v48 = vadd.f32 1.0, %v2032_v63  ;;  %v1733_v5 = vpop.f32.mrb[35].mxu1 }
 0x30f   : > { %v2034_v6 = vpop.eup %2033  ;;  %v1413_v7 = vadd.f32 %v1731_v28, %v2658_v36  ;;  %v1734_v9 = vadd.f32 %v1733_v5, %v1732_v21 }
 0x310   : > { %v1499_v15 = vmul.f32 %v1483_v48, %v1435_v2  ;;  %v1484_v23 = vadd.f32 1.0, %v2034_v6 }
 0x311   : > { %v1455_v58 = vmul.f32 0.70710677, %v1413_v7  ;;  %v1416_v59 = vadd.f32 %v1734_v9, %v2658_v36  ;;  %v1439_v42 = vmul.f32 0.5, %v1413_v7 }
 0x312   : > { %1515 = vst [vmem:[%s2668_s17 + $0x40] sm:$0xff] %v1499_v15  ;;  %v1500_v1 = vmul.f32 %v1484_v23, %v1436_v4 }
 0x313   : > { %2039 = verf.f32 %v1455_v58  ;;  %v1456_v62 = vmul.f32 0.70710677, %v1416_v59  ;;  %v1735_v0 = vpop.f32.mrb[36].mxu1  ;;  %v1440_v35 = vmul.f32 0.5, %v1416_v59 }
 0x314   : > { %1516 = vst [vmem:[%s2668_s17 + $0x48] sm:$0xff] %v1500_v1  ;;  %v1736_v3 = vpop.f32.mrb[37].mxu1 }
 0x315   : > { %v2036_v24 = vpop.eup %2035  ;;  %2041 = verf.f32 %v1456_v62  ;;  %v1737_v12 = vadd.f32 %v1736_v3, %v1735_v0  ;;  %v1738_v18 = vpop.f32.mrb[38].mxu1 }
 0x316   : > { %v1485_v52 = vadd.f32 1.0, %v2036_v24  ;;  %v1739_v8 = vpop.f32.mrb[39].mxu1 }
 0x317   : > { %v2038_v27 = vpop.eup %2037  ;;  %v1421_v22 = vadd.f32 %v1737_v12, %v2658_v36  ;;  %v1740_v13 = vadd.f32 %v1739_v8, %v1738_v18 }
 0x318   : > { %v1501_v26 = vmul.f32 %v1485_v52, %v1437_v25  ;;  %v1486_v14 = vadd.f32 1.0, %v2038_v27 }
 0x319   : > { %v1457_v32 = vmul.f32 0.70710677, %v1421_v22  ;;  %v1424_v57 = vadd.f32 %v1740_v13, %v2658_v36  ;;  %v1441_v51 = vmul.f32 0.5, %v1421_v22 }
 0x31a   : > { %1517 = vst [vmem:[%s2668_s17 + $0x50] sm:$0xff] %v1501_v26  ;;  %v1502_v30 = vmul.f32 %v1486_v14, %v1438_v31 }
 0x31b   : > { %2043 = verf.f32 %v1457_v32  ;;  %v1458_v38 = vmul.f32 0.70710677, %v1424_v57  ;;  %v1442_v40 = vmul.f32 0.5, %v1424_v57 }
 0x31c   : > { %1518 = vst [vmem:[%s2668_s17 + $0x58] sm:$0xff] %v1502_v30 }
 0x31d   : > { %v2040_v39 = vpop.eup %2039  ;;  %2045 = verf.f32 %v1458_v38 }
 0x31e   : > { %v1487_v44 = vadd.f32 1.0, %v2040_v39 }
 0x31f   : > { %v2042_v45 = vpop.eup %2041 }
 0x320   : > { %v1503_v47 = vmul.f32 %v1487_v44, %v1439_v42  ;;  %v1488_v29 = vadd.f32 1.0, %v2042_v45 }
 0x322   : > { %1519 = vst [vmem:[%s2668_s17 + $0x60] sm:$0xff] %v1503_v47  ;;  %v1504_v36 = vmul.f32 %v1488_v29, %v1440_v35 }
 0x324   : > { %1520 = vst [vmem:[%s2668_s17 + $0x68] sm:$0xff] %v1504_v36 }
 0x325   : > { %v2044_v49 = vpop.eup %2043 }
 0x326   : > { %v1489_v37 = vadd.f32 1.0, %v2044_v49 }
 0x327   : > { %v2046_v53 = vpop.eup %2045 }
 0x328   : > { %v1505_v33 = vmul.f32 %v1489_v37, %v1441_v51  ;;  %v1490_v17 = vadd.f32 1.0, %v2046_v53 }
 0x32a   : > { %1521 = vst [vmem:[%s2668_s17 + $0x70] sm:$0xff] %v1505_v33  ;;  %v1506_v16 = vmul.f32 %v1490_v17, %v1442_v40 }
 0x32c   : > { %1522 = vst [vmem:[%s2668_s17 + $0x78] sm:$0xff] %v1506_v16 }
 0x32d   : > { %2060 = shalt.err (!%p2057_p3)
}
 0x32e   : > { %s2061_s14 = scalar_lea.hbm %s2700_s23, 2048  ;;  %s2065_s13 = scalar_lea.hbm %s2756_s7, 4096 }
 0x32f   : > { %p2062_p4 = scmp.ne.s32.totalorder %s2700_s23, %s2061_s14  ;;  %p2066_p9 = scmp.lt.u32.totalorder %s2700_s23, %s2756_s7 }
 0x330   : > { %p2067_p10 = scmp.lt.u32.totalorder %s2065_s13, %s2061_s14  ;;  %p2069_p12 = scmp.lt.u32.totalorder %s2061_s14, %s2700_s23 }
 0x331   : > { %p2063_p7 = pnand %p2062_p4, %p2193_p5 }
 0x332   : > { %p2068_p11 = por %p2067_p10, %p2066_p9 }
 0x333   : > { %p2064_p8 = pneg %p2063_p7 }
 0x334   : > { %p2070_p13 = por %p2069_p12, %p2068_p11 }
 0x336   : > { %p2071_p0 = pnand %p2070_p13, %p2064_p8 }
 0x338   : > { %2074 = shalt.err (!%p2071_p0)
}
 0x339   : > { %s2113_s20 = smov 128   ;;  %s2114_s22 = smov 8  }
 0x33a   : > { %1757 = dma.vmem_to_hbm [thread:$0]  (%p2193_p5), %s2702_s19, 2048, %s2700_s23, %s2708_s28, %s2113_s20, %s2113_s20, %s2114_s22  }
 0x33b PF: > { %p1763_p1 = scmp.ge.s32.totalorder %s2109_s27, 2  ;;  %s1552_s21 = sand.u32 1, %s2097_s24  }
 0x33c   : > { %s1553_s29 = scalar_lea.sflag [#allocation3], %s1552_s21 }
 0x33d   : > { %p1760_p2 = pnand %p1763_p1, %p2197_p6 }
 0x33f   : > { %2092 = dma.done.wait (!%p1760_p2), %s1553_s29, 2048  }
 0x340   : > { %2094 = vsyncadd (!%p1760_p2), %s1553_s29, 4294965248  ;;  %p17_p3 = scmp.ge.s32.totalorder %s2180_s30, 4   ;;  %s2759_s24 = smov %s2101_s25 }
 0x341   : > { %s2760_s25 = smov %s2105_s26  ;;  %s2761_s26 = smov %s2191_s10 }
 0x342   : > { %s2762_s27 = smov %s2180_s30  ;;  %19 = sbr.rel (!%p17_p3) target bundleno = 3 (0x3), region = 83 }
 0x349   :  { %1558 = vsyncpa [#allocation3], 1 }
 0x34a   :  { %1560 = vsyncpa [#allocation3 + $0x1], 1 }

</bundles_post_ra>
